<compile_context>
chip_gen: v7x
topology: tpu7x:2x2x1
jax: 0.10.0
libtpu: 0.0.40
codegen_flags: <defaults>
</compile_context>

<pallas_src>
import math
import functools

import jax
import jax.numpy as jnp
import numpy as np
from jax import lax
from jax.experimental import pallas as pl
from jax.experimental.pallas import tpu as pltpu


def _vmem_limit_bytes():
    # Generation-dependent scoped-VMEM limit: ~3/4 of physical capacity.
    cap = 64 * 1024 * 1024
    try:
        info = pltpu.get_tpu_info()
        cap = int(getattr(info, "vmem_capacity_bytes", cap))
    except Exception:
        pass
    return max(32 * 1024 * 1024, (cap * 3) // 4)


def _heads_per_step(num_heads, head_dim):
    # Smallest head-group size giving a lane-dense (multiple-of-128) ctx store;
    # fall back to all heads (ctx block lane = E = full dim, still legal).
    for g in range(1, num_heads):
        if num_heads % g == 0 and (g * head_dim) % 128 == 0:
            return g
    return num_heads


# -----------------------------------------------------------------------------
# Fused kernel: per (batch b, head-group g) step
#   q/k/v projection -> stacked scores+bias MXU push -> SSAN bias -> softmax -> ctx
# -----------------------------------------------------------------------------
def _ssan_attn_kernel(x_ref, w_ref, b_ref, mask_ref, diag_ref, struct_ref,
                      abs_ref, *rest, num_struct, heads_per_step, with_probs):
    if with_probs:
        ctx_ref, probs_ref, struct_f32 = rest
    else:
        ctx_ref, struct_f32 = rest
        probs_ref = None

    g = pl.program_id(1)          # head-group index (inner, "arbitrary" axis)
    G = heads_per_step
    cdt = x_ref.dtype

    # Cast the (resident) int8 structure matrices to f32 once per batch element.
    @pl.when(g == 0)
    def _():
        for i in range(num_struct):
            struct_f32[i] = struct_ref[i, 0, 0].astype(jnp.float32)

    x = x_ref[0]                                               # (S, E) compute dtype
    S = x.shape[0]
    mask_row = mask_ref[0, 0, 0].astype(jnp.float32)[None, :]  # (1, S) additive mask

    ctx_parts = []
    for gg in range(G):                                        # static unroll (G small: 1-2 real, H tiny test)
        wq, wk, wv = w_ref[0, gg], w_ref[1, gg], w_ref[2, gg]  # (E, D) each, compute dtype
        bq, bk, bv = b_ref[0, gg], b_ref[1, gg], b_ref[2, gg]  # (1, D) f32

        # Per-head projection on the MXU.  q is pre-scaled by 1/sqrt(D) (folded into wq/bq).
        q = (jnp.dot(x, wq, preferred_element_type=jnp.float32) + bq).astype(cdt)
        k = (jnp.dot(x, wk, preferred_element_type=jnp.float32) + bk).astype(cdt)
        v = (jnp.dot(x, wv, preferred_element_type=jnp.float32) + bv).astype(cdt)

        dw = diag_ref[gg]                                      # (num_struct, D), pre-scaled by sqrt(D)

        # Single stacked MXU push: [q ; q*dw_0 ; ... ; q*dw_4] contracted against k
        # (lax.dot_general with last-dim contraction: no materialized k^T copy).
        q_stack = jnp.concatenate(
            [q] + [q * dw[i][None, :] for i in range(num_struct)], axis=0)   # ((1+ns)S, D)
        scores_all = lax.dot_general(q_stack, k, (((1,), (1,)), ((), ())),
                                     preferred_element_type=jnp.float32)    # ((1+ns)S, S)

        scores = scores_all[:S] + mask_row
        for i in range(num_struct):
            bias_i = scores_all[(i + 1) * S:(i + 2) * S]
            abs_i = abs_ref[i, g * G + gg]                     # SMEM scalar
            scores = scores + (bias_i + abs_i) * struct_f32[i]

        # Numerically stable softmax over keys (f32).
        m = jnp.max(scores, axis=-1, keepdims=True)
        p = jnp.exp(scores - m)
        l = jnp.sum(p, axis=-1, keepdims=True)
        if with_probs:
            probs = p / l                                      # exact: returned rows sum to 1
            probs_ref[0, gg] = probs.astype(probs_ref.dtype)
        else:
            probs = p * pl.reciprocal(l, approx=True)          # EUP slot (free-ish)

        ctx_parts.append(jnp.dot(probs.astype(cdt), v,
                                 preferred_element_type=jnp.float32))

    # One lane-dense store of the whole head-group (G*D lanes).
    ctx_ref[0] = jnp.concatenate(ctx_parts, axis=-1).astype(ctx_ref.dtype)


def ssan_attention_call(x, w_pack, b_pack, mask, diag_hd, struct_i8, abs_bias,
                        *, heads_per_step, output_attentions):
    B, S, E = x.shape
    _, H, _, D = w_pack.shape
    ns = struct_i8.shape[0]
    G = heads_per_step
    cdt = x.dtype

    kernel = functools.partial(_ssan_attn_kernel, num_struct=ns,
                               heads_per_step=G, with_probs=output_attentions)

    out_shape = [jax.ShapeDtypeStruct((B, S, E), cdt)]
    out_specs = [pl.BlockSpec((1, S, G * D), lambda b, g: (b, 0, g))]
    if output_attentions:
        out_shape.append(jax.ShapeDtypeStruct((B, H, S, S), cdt))
        out_specs.append(pl.BlockSpec((1, G, S, S), lambda b, g: (b, g, 0, 0)))

    outs = pl.pallas_call(
        kernel,
        out_shape=tuple(out_shape),
        grid=(B, H // G),
        in_specs=[
            pl.BlockSpec((1, S, E), lambda b, g: (b, 0, 0)),               # x (resident over g)
            pl.BlockSpec((3, G, E, D), lambda b, g: (0, g, 0, 0)),         # packed q|k|v weights
            pl.BlockSpec((3, G, 1, D), lambda b, g: (0, g, 0, 0)),         # packed biases (f32)
            pl.BlockSpec((1, 1, 1, S), lambda b, g: (b, 0, 0, 0)),         # additive mask (resident)
            pl.BlockSpec((G, ns, D), lambda b, g: (g, 0, 0)),              # diag(W_ssan)
            pl.BlockSpec((ns, 1, 1, S, S), lambda b, g: (0, b, 0, 0, 0)),  # struct int8 (resident)
            pl.BlockSpec(memory_space=pltpu.MemorySpace.SMEM),             # abs_bias (5, H)
        ],
        out_specs=tuple(out_specs),
        scratch_shapes=[pltpu.VMEM((ns, S, S), jnp.float32)],              # per-batch f32 struct cache
        compiler_params=pltpu.CompilerParams(
            # batch axis parallel (megacore split); head-group axis must stay "arbitrary"
            # so the per-batch struct precast at g == 0 is ordered before g > 0 steps.
            dimension_semantics=("parallel", "arbitrary"),
            vmem_limit_bytes=_vmem_limit_bytes()),
    )(x, w_pack, b_pack, mask, diag_hd, struct_i8, abs_bias)

    if not isinstance(outs, (tuple, list)):
        outs = (outs,)
    return tuple(outs)


# -----------------------------------------------------------------------------
# One-time parameter transform (packing + scale folding, NOT per forward call).
# -----------------------------------------------------------------------------
def prepare_ssan_params(params, compute_dtype=jnp.bfloat16):
    H, D = params["num_heads"], params["head_dim"]
    E = H * D
    inv_sqrt_d = 1.0 / math.sqrt(D)

    def split_w(w):   # (E, E) with per-head output columns -> (H, E, D)
        return w.reshape(E, H, D).transpose(1, 0, 2)

    def split_b(b):   # (E,) -> (H, 1, D)
        return b.reshape(H, 1, D)

    # Fold 1/sqrt(D) into the Q projection so the kernel never rescales scores.
    w_pack = jnp.stack([split_w(params["wq"] * inv_sqrt_d),
                        split_w(params["wk"]),
                        split_w(params["wv"])], axis=0)                    # (3, H, E, D)
    b_pack = jnp.stack([split_b(params["bq"] * inv_sqrt_d),
                        split_b(params["bk"]),
                        split_b(params["bv"])], axis=0)                    # (3, H, 1, D)

    # einsum 'bnqd,ndd,bnkd->bnqk' only sees diag(W); sqrt(D) compensates the 1/sqrt(D)
    # folded into q.
    ssan_diag = jnp.diagonal(params["ssan_w"], axis1=-2, axis2=-1)         # (5, H, D)
    diag_hd = jnp.transpose(ssan_diag, (1, 0, 2)) * math.sqrt(D)           # (H, 5, D)

    return dict(
        num_heads=H, head_dim=D, compute_dtype=compute_dtype,
        w_pack=w_pack.astype(compute_dtype),
        b_pack=b_pack.astype(jnp.float32),
        diag_hd=diag_hd.astype(compute_dtype),
        abs_bias=params["abs_bias"].astype(jnp.float32),
    )


def ssan_forward(hidden, attention_mask, prepared, struct_matrix, *,
                 output_attentions=False):
    """SSANAttention.forward (standard self-attention path)."""
    cdt = prepared["compute_dtype"]
    H, D = prepared["num_heads"], prepared["head_dim"]
    B, S, E = hidden.shape
    G = _heads_per_step(H, D)

    x = hidden.astype(cdt)
    mask = attention_mask.astype(jnp.float32)           # (B, 1, 1, S) additive
    # struct values are exactly {0, 1}: ship as int8 (callers should pre-cast once).
    struct_i8 = struct_matrix if struct_matrix.dtype == jnp.int8 \
        else struct_matrix.astype(jnp.int8)              # (5, B, 1, S, S)

    outs = ssan_attention_call(x, prepared["w_pack"], prepared["b_pack"], mask,
                               prepared["diag_hd"], struct_i8,
                               prepared["abs_bias"],
                               heads_per_step=G,
                               output_attentions=output_attentions)
    context_layer = outs[0]                               # (B, S, E), compute dtype, final layout
    if output_attentions:
        return context_layer, outs[1]
    return (context_layer,)


# -----------------------------------------------------------------------------
# Pure-JAX reference (mirrors the PyTorch forward literally, incl. the
# repeated-index einsum) for correctness checking.
# -----------------------------------------------------------------------------
def ssan_forward_ref(hidden, attention_mask, params, struct_matrix):
    B, S, E = hidden.shape
    H, D = params["num_heads"], params["head_dim"]
    hi = jax.lax.Precision.HIGHEST

    def proj(w, b):
        y = jnp.einsum("bse,ef->bsf", hidden, w, precision=hi) + b
        return y.reshape(B, S, H, D).transpose(0, 2, 1, 3)

    q = proj(params["wq"], params["bq"])
    k = proj(params["wk"], params["bk"])
    v = proj(params["wv"], params["bv"])

    scores = jnp.einsum("bhqd,bhkd->bhqk", q, k, precision=hi) / math.sqrt(D)
    scores = scores + attention_mask
    for i in range(5):
        bias = jnp.einsum("bnqd,ndd,bnkd->bnqk", q, params["ssan_w"][i], k,
                          precision=hi)
        scores = scores + (bias + params["abs_bias"][i][None, :, None, None]) \
                          * struct_matrix[i]
    probs = jax.nn.softmax(scores, axis=-1)
    ctx = jnp.einsum("bhqk,bhkd->bhqd", probs, v, precision=hi)
    ctx = ctx.transpose(0, 2, 1, 3).reshape(B, S, H * D)
    return ctx, probs


# -----------------------------------------------------------------------------
if __name__ == "__main__":
    B, S, H, D = 2, 8, 4, 8
    E = H * D  # 32

    key = jax.random.PRNGKey(0)
    keys = jax.random.split(key, 8)

    hidden = jax.random.normal(keys[0], (B, S, E), dtype=jnp.float32)

    # Additive BERT-style attention mask: 0 keep, -10000 masked.
    attention_mask = jnp.zeros((B, 1, 1, S), dtype=jnp.float32)
    attention_mask = attention_mask.at[1, 0, 0, S - 2:].set(-10000.0)

    # Structure matrices: 5 binary (B, 1, S, S) patterns.
    struct_matrix = (jax.random.uniform(keys[1], (5, B, 1, S, S)) > 0.5
                     ).astype(jnp.float32)

    def xavier(k, shape, fan_in, fan_out):
        bound = math.sqrt(6.0 / (fan_in + fan_out))
        return jax.random.uniform(k, shape, jnp.float32, -bound, bound)

    params = dict(
        num_heads=H,
        head_dim=D,
        # Linear weights stored as (in, out) so y = x @ W + b.
        wq=xavier(keys[2], (E, E), E, E), bq=jnp.zeros((E,), jnp.float32),
        wk=xavier(keys[3], (E, E), E, E), bk=jnp.zeros((E,), jnp.float32),
        wv=xavier(keys[4], (E, E), E, E), bv=jnp.zeros((E,), jnp.float32),
        ssan_w=xavier(keys[5], (5, H, D, D), D, D),
        # torch init is zeros; use small values so the bias path is exercised.
        abs_bias=0.1 * jax.random.normal(keys[6], (5, H), dtype=jnp.float32),
    )

    ctx_ref, probs_ref = ssan_forward_ref(hidden, attention_mask, params,
                                          struct_matrix)

    # 1) f32 compute path: tight semantic validation.
    prep_f32 = prepare_ssan_params(params, compute_dtype=jnp.float32)
    ctx_f32, probs_f32 = ssan_forward(hidden, attention_mask, prep_f32,
                                      struct_matrix, output_attentions=True)
    jax.block_until_ready((ctx_f32, probs_f32))
    np.testing.assert_allclose(np.asarray(ctx_f32), np.asarray(ctx_ref),
                               rtol=5e-3, atol=5e-3)
    np.testing.assert_allclose(np.asarray(probs_f32), np.asarray(probs_ref),
                               rtol=5e-3, atol=5e-3)

    # 2) bf16 production path (with probs): looser tolerance vs the f32 reference.
    prep_bf16 = prepare_ssan_params(params, compute_dtype=jnp.bfloat16)
    ctx_bf, probs_bf = ssan_forward(hidden, attention_mask, prep_bf16,
                                    struct_matrix, output_attentions=True)
    jax.block_until_ready((ctx_bf, probs_bf))
    np.testing.assert_allclose(np.asarray(ctx_bf.astype(jnp.float32)),
                               np.asarray(ctx_ref), rtol=1e-1, atol=1e-1)
    np.testing.assert_allclose(np.asarray(probs_bf.astype(jnp.float32)),
                               np.asarray(probs_ref), rtol=1e-1, atol=1e-1)

    # 3) Production path without the (B,H,S,S) probs writeback (approx reciprocal).
    (ctx_only,) = ssan_forward(hidden, attention_mask, prep_bf16, struct_matrix,
                               output_attentions=False)
    jax.block_until_ready(ctx_only)
    assert ctx_only.shape == (B, S, E)
    np.testing.assert_allclose(np.asarray(ctx_only.astype(jnp.float32)),
                               np.asarray(ctx_ref), rtol=1e-1, atol=1e-1)

    print("KERNEL_OK")
</pallas_src>

<mosaic_0001>
module attributes {stable_mosaic.version = 11 : i64} {
  func.func @_ssan_attn_kernel(%arg0: i32, %arg1: i32, %arg2: memref<1x8x32xf32, #tpu.memory_space<vmem>>, %arg3: memref<3x4x32x8xf32, #tpu.memory_space<vmem>>, %arg4: memref<3x4x1x8xf32, #tpu.memory_space<vmem>>, %arg5: memref<1x1x1x8xf32, #tpu.memory_space<vmem>>, %arg6: memref<4x5x8xf32, #tpu.memory_space<vmem>>, %arg7: memref<5x1x1x8x8xi8, #tpu.memory_space<vmem>>, %arg8: memref<5x4xf32, #tpu.memory_space<smem>>, %arg9: memref<1x8x32xf32, #tpu.memory_space<vmem>>, %arg10: memref<1x4x8x8xf32, #tpu.memory_space<vmem>>, %arg11: memref<5x8x8xf32, #tpu.memory_space<vmem>>) attributes {dimension_semantics = [#tpu.dimension_semantics<parallel>, #tpu.dimension_semantics<arbitrary>], iteration_bounds = array<i64: 2, 1>, scalar_prefetch = 0 : i64, scratch_operands = 1 : i64, tpu.core_type = #tpu.core_type<tc>, window_params = [{transform_indices = @transform_0, window_bounds = array<i64: 1, 8, 32>}, {transform_indices = @transform_1, window_bounds = array<i64: 3, 4, 32, 8>}, {transform_indices = @transform_2, window_bounds = array<i64: 3, 4, 1, 8>}, {transform_indices = @transform_3, window_bounds = array<i64: 1, 1, 1, 8>}, {transform_indices = @transform_4, window_bounds = array<i64: 4, 5, 8>}, {transform_indices = @transform_5, window_bounds = array<i64: 5, 1, 1, 8, 8>}, {transform_indices = @transform_6, window_bounds = array<i64: 5, 4>}, {transform_indices = @transform_7, window_bounds = array<i64: 1, 8, 32>}, {transform_indices = @transform_8, window_bounds = array<i64: 1, 4, 8, 8>}]} {
    %c0_i32 = arith.constant 0 : i32
    %0 = arith.cmpi eq, %arg1, %c0_i32 : i32
    %1 = arith.extui %0 : i1 to i32
    %c0_i32_0 = arith.constant 0 : i32
    %2 = arith.cmpi ne, %1, %c0_i32_0 : i32
    scf.if %2 {
      %c0_273 = arith.constant 0 : index
      %c0_274 = arith.constant 0 : index
      %c0_275 = arith.constant 0 : index
      %c0_276 = arith.constant 0 : index
      %c0_277 = arith.constant 0 : index
      %496 = vector.load %arg7[%c0_273, %c0_274, %c0_275, %c0_276, %c0_277] : memref<5x1x1x8x8xi8, #tpu.memory_space<vmem>>, vector<1x1x1x8x8xi8>
      %497 = vector.shape_cast %496 : vector<1x1x1x8x8xi8> to vector<8x8xi8>
      %498 = arith.sitofp %497 : vector<8x8xi8> to vector<8x8xf32>
      %c0_278 = arith.constant 0 : index
      %c0_279 = arith.constant 0 : index
      %c0_280 = arith.constant 0 : index
      %499 = vector.load %arg11[%c0_278, %c0_279, %c0_280] : memref<5x8x8xf32, #tpu.memory_space<vmem>>, vector<1x8x8xf32>
      %500 = vector.shape_cast %499 : vector<1x8x8xf32> to vector<8x8xf32>
      %501 = vector.shape_cast %498 : vector<8x8xf32> to vector<1x8x8xf32>
      tpu.vector_store %arg11[%c0_278, %c0_279, %c0_280], %501 {strides = array<i32>} : memref<5x8x8xf32, #tpu.memory_space<vmem>>, vector<1x8x8xf32>,
      %c1_281 = arith.constant 1 : index
      %c0_282 = arith.constant 0 : index
      %c0_283 = arith.constant 0 : index
      %c0_284 = arith.constant 0 : index
      %c0_285 = arith.constant 0 : index
      %502 = vector.load %arg7[%c1_281, %c0_282, %c0_283, %c0_284, %c0_285] : memref<5x1x1x8x8xi8, #tpu.memory_space<vmem>>, vector<1x1x1x8x8xi8>
      %503 = vector.shape_cast %502 : vector<1x1x1x8x8xi8> to vector<8x8xi8>
      %504 = arith.sitofp %503 : vector<8x8xi8> to vector<8x8xf32>
      %c1_286 = arith.constant 1 : index
      %c0_287 = arith.constant 0 : index
      %c0_288 = arith.constant 0 : index
      %505 = vector.load %arg11[%c1_286, %c0_287, %c0_288] : memref<5x8x8xf32, #tpu.memory_space<vmem>>, vector<1x8x8xf32>
      %506 = vector.shape_cast %505 : vector<1x8x8xf32> to vector<8x8xf32>
      %507 = vector.shape_cast %504 : vector<8x8xf32> to vector<1x8x8xf32>
      tpu.vector_store %arg11[%c1_286, %c0_287, %c0_288], %507 {strides = array<i32>} : memref<5x8x8xf32, #tpu.memory_space<vmem>>, vector<1x8x8xf32>,
      %c2_289 = arith.constant 2 : index
      %c0_290 = arith.constant 0 : index
      %c0_291 = arith.constant 0 : index
      %c0_292 = arith.constant 0 : index
      %c0_293 = arith.constant 0 : index
      %508 = vector.load %arg7[%c2_289, %c0_290, %c0_291, %c0_292, %c0_293] : memref<5x1x1x8x8xi8, #tpu.memory_space<vmem>>, vector<1x1x1x8x8xi8>
      %509 = vector.shape_cast %508 : vector<1x1x1x8x8xi8> to vector<8x8xi8>
      %510 = arith.sitofp %509 : vector<8x8xi8> to vector<8x8xf32>
      %c2_294 = arith.constant 2 : index
      %c0_295 = arith.constant 0 : index
      %c0_296 = arith.constant 0 : index
      %511 = vector.load %arg11[%c2_294, %c0_295, %c0_296] : memref<5x8x8xf32, #tpu.memory_space<vmem>>, vector<1x8x8xf32>
      %512 = vector.shape_cast %511 : vector<1x8x8xf32> to vector<8x8xf32>
      %513 = vector.shape_cast %510 : vector<8x8xf32> to vector<1x8x8xf32>
      tpu.vector_store %arg11[%c2_294, %c0_295, %c0_296], %513 {strides = array<i32>} : memref<5x8x8xf32, #tpu.memory_space<vmem>>, vector<1x8x8xf32>,
      %c3_297 = arith.constant 3 : index
      %c0_298 = arith.constant 0 : index
      %c0_299 = arith.constant 0 : index
      %c0_300 = arith.constant 0 : index
      %c0_301 = arith.constant 0 : index
      %514 = vector.load %arg7[%c3_297, %c0_298, %c0_299, %c0_300, %c0_301] : memref<5x1x1x8x8xi8, #tpu.memory_space<vmem>>, vector<1x1x1x8x8xi8>
      %515 = vector.shape_cast %514 : vector<1x1x1x8x8xi8> to vector<8x8xi8>
      %516 = arith.sitofp %515 : vector<8x8xi8> to vector<8x8xf32>
      %c3_302 = arith.constant 3 : index
      %c0_303 = arith.constant 0 : index
      %c0_304 = arith.constant 0 : index
      %517 = vector.load %arg11[%c3_302, %c0_303, %c0_304] : memref<5x8x8xf32, #tpu.memory_space<vmem>>, vector<1x8x8xf32>
      %518 = vector.shape_cast %517 : vector<1x8x8xf32> to vector<8x8xf32>
      %519 = vector.shape_cast %516 : vector<8x8xf32> to vector<1x8x8xf32>
      tpu.vector_store %arg11[%c3_302, %c0_303, %c0_304], %519 {strides = array<i32>} : memref<5x8x8xf32, #tpu.memory_space<vmem>>, vector<1x8x8xf32>,
      %c4_305 = arith.constant 4 : index
      %c0_306 = arith.constant 0 : index
      %c0_307 = arith.constant 0 : index
      %c0_308 = arith.constant 0 : index
      %c0_309 = arith.constant 0 : index
      %520 = vector.load %arg7[%c4_305, %c0_306, %c0_307, %c0_308, %c0_309] : memref<5x1x1x8x8xi8, #tpu.memory_space<vmem>>, vector<1x1x1x8x8xi8>
      %521 = vector.shape_cast %520 : vector<1x1x1x8x8xi8> to vector<8x8xi8>
      %522 = arith.sitofp %521 : vector<8x8xi8> to vector<8x8xf32>
      %c4_310 = arith.constant 4 : index
      %c0_311 = arith.constant 0 : index
      %c0_312 = arith.constant 0 : index
      %523 = vector.load %arg11[%c4_310, %c0_311, %c0_312] : memref<5x8x8xf32, #tpu.memory_space<vmem>>, vector<1x8x8xf32>
      %524 = vector.shape_cast %523 : vector<1x8x8xf32> to vector<8x8xf32>
      %525 = vector.shape_cast %522 : vector<8x8xf32> to vector<1x8x8xf32>
      tpu.vector_store %arg11[%c4_310, %c0_311, %c0_312], %525 {strides = array<i32>} : memref<5x8x8xf32, #tpu.memory_space<vmem>>, vector<1x8x8xf32>,
    } else {
    }
    %c0 = arith.constant 0 : index
    %c0_1 = arith.constant 0 : index
    %c0_2 = arith.constant 0 : index
    %3 = vector.load %arg2[%c0, %c0_1, %c0_2] : memref<1x8x32xf32, #tpu.memory_space<vmem>>, vector<1x8x32xf32>
    %4 = vector.shape_cast %3 : vector<1x8x32xf32> to vector<8x32xf32>
    %c0_3 = arith.constant 0 : index
    %c0_4 = arith.constant 0 : index
    %c0_5 = arith.constant 0 : index
    %c0_6 = arith.constant 0 : index
    %5 = vector.load %arg5[%c0_3, %c0_4, %c0_5, %c0_6] : memref<1x1x1x8xf32, #tpu.memory_space<vmem>>, vector<1x1x1x8xf32>
    %6 = vector.shape_cast %5 : vector<1x1x1x8xf32> to vector<8xf32>
    %7 = vector.shape_cast %6 : vector<8xf32> to vector<1x8xf32>
    %c0_7 = arith.constant 0 : index
    %c0_8 = arith.constant 0 : index
    %c0_9 = arith.constant 0 : index
    %c0_10 = arith.constant 0 : index
    %8 = vector.load %arg3[%c0_7, %c0_8, %c0_9, %c0_10] : memref<3x4x32x8xf32, #tpu.memory_space<vmem>>, vector<1x1x32x8xf32>
    %9 = vector.shape_cast %8 : vector<1x1x32x8xf32> to vector<32x8xf32>
    %c1 = arith.constant 1 : index
    %c0_11 = arith.constant 0 : index
    %c0_12 = arith.constant 0 : index
    %c0_13 = arith.constant 0 : index
    %10 = vector.load %arg3[%c1, %c0_11, %c0_12, %c0_13] : memref<3x4x32x8xf32, #tpu.memory_space<vmem>>, vector<1x1x32x8xf32>
    %11 = vector.shape_cast %10 : vector<1x1x32x8xf32> to vector<32x8xf32>
    %c2 = arith.constant 2 : index
    %c0_14 = arith.constant 0 : index
    %c0_15 = arith.constant 0 : index
    %c0_16 = arith.constant 0 : index
    %12 = vector.load %arg3[%c2, %c0_14, %c0_15, %c0_16] : memref<3x4x32x8xf32, #tpu.memory_space<vmem>>, vector<1x1x32x8xf32>
    %13 = vector.shape_cast %12 : vector<1x1x32x8xf32> to vector<32x8xf32>
    %c0_17 = arith.constant 0 : index
    %c0_18 = arith.constant 0 : index
    %c0_19 = arith.constant 0 : index
    %c0_20 = arith.constant 0 : index
    %14 = vector.load %arg4[%c0_17, %c0_18, %c0_19, %c0_20] : memref<3x4x1x8xf32, #tpu.memory_space<vmem>>, vector<1x1x1x8xf32>
    %15 = vector.shape_cast %14 : vector<1x1x1x8xf32> to vector<1x8xf32>
    %c1_21 = arith.constant 1 : index
    %c0_22 = arith.constant 0 : index
    %c0_23 = arith.constant 0 : index
    %c0_24 = arith.constant 0 : index
    %16 = vector.load %arg4[%c1_21, %c0_22, %c0_23, %c0_24] : memref<3x4x1x8xf32, #tpu.memory_space<vmem>>, vector<1x1x1x8xf32>
    %17 = vector.shape_cast %16 : vector<1x1x1x8xf32> to vector<1x8xf32>
    %c2_25 = arith.constant 2 : index
    %c0_26 = arith.constant 0 : index
    %c0_27 = arith.constant 0 : index
    %c0_28 = arith.constant 0 : index
    %18 = vector.load %arg4[%c2_25, %c0_26, %c0_27, %c0_28] : memref<3x4x1x8xf32, #tpu.memory_space<vmem>>, vector<1x1x1x8xf32>
    %19 = vector.shape_cast %18 : vector<1x1x1x8xf32> to vector<1x8xf32>
    %cst = arith.constant dense<0.000000e+00> : vector<8x8xf32>
    %20 = tpu.matmul %4, %9, %cst {dimension_numbers = #tpu.dot_dimension_numbers<[1], [0], [0], [1], [0, 0, 1, 1], [], []>} : vector<8x32xf32>, vector<32x8xf32>, vector<8x8xf32> -> vector<8x8xf32>
    %21 = vector.broadcast %15 : vector<1x8xf32> to vector<8x8xf32>
    %22 = arith.addf %20, %21 : vector<8x8xf32>
    %cst_29 = arith.constant dense<0.000000e+00> : vector<8x8xf32>
    %23 = tpu.matmul %4, %11, %cst_29 {dimension_numbers = #tpu.dot_dimension_numbers<[1], [0], [0], [1], [0, 0, 1, 1], [], []>} : vector<8x32xf32>, vector<32x8xf32>, vector<8x8xf32> -> vector<8x8xf32>
    %24 = vector.broadcast %17 : vector<1x8xf32> to vector<8x8xf32>
    %25 = arith.addf %23, %24 : vector<8x8xf32>
    %cst_30 = arith.constant dense<0.000000e+00> : vector<8x8xf32>
    %26 = tpu.matmul %4, %13, %cst_30 {dimension_numbers = #tpu.dot_dimension_numbers<[1], [0], [0], [1], [0, 0, 1, 1], [], []>} : vector<8x32xf32>, vector<32x8xf32>, vector<8x8xf32> -> vector<8x8xf32>
    %27 = vector.broadcast %19 : vector<1x8xf32> to vector<8x8xf32>
    %28 = arith.addf %26, %27 : vector<8x8xf32>
    %c0_31 = arith.constant 0 : index
    %c0_32 = arith.constant 0 : index
    %c0_33 = arith.constant 0 : index
    %29 = vector.load %arg6[%c0_31, %c0_32, %c0_33] : memref<4x5x8xf32, #tpu.memory_space<vmem>>, vector<1x5x8xf32>
    %30 = vector.shape_cast %29 : vector<1x5x8xf32> to vector<5x8xf32>
    %31 = vector.extract_strided_slice %30 {offsets = [0, 0], sizes = [1, 8], strides = [1, 1]} : vector<5x8xf32> to vector<1x8xf32>
    %32 = vector.shape_cast %31 : vector<1x8xf32> to vector<8xf32>
    %33 = vector.shape_cast %32 : vector<8xf32> to vector<1x8xf32>
    %34 = vector.broadcast %33 : vector<1x8xf32> to vector<8x8xf32>
    %35 = arith.mulf %22, %34 : vector<8x8xf32>
    %36 = vector.extract_strided_slice %30 {offsets = [1, 0], sizes = [1, 8], strides = [1, 1]} : vector<5x8xf32> to vector<1x8xf32>
    %37 = vector.shape_cast %36 : vector<1x8xf32> to vector<8xf32>
    %38 = vector.shape_cast %37 : vector<8xf32> to vector<1x8xf32>
    %39 = vector.broadcast %38 : vector<1x8xf32> to vector<8x8xf32>
    %40 = arith.mulf %22, %39 : vector<8x8xf32>
    %41 = vector.extract_strided_slice %30 {offsets = [2, 0], sizes = [1, 8], strides = [1, 1]} : vector<5x8xf32> to vector<1x8xf32>
    %42 = vector.shape_cast %41 : vector<1x8xf32> to vector<8xf32>
    %43 = vector.shape_cast %42 : vector<8xf32> to vector<1x8xf32>
    %44 = vector.broadcast %43 : vector<1x8xf32> to vector<8x8xf32>
    %45 = arith.mulf %22, %44 : vector<8x8xf32>
    %46 = vector.extract_strided_slice %30 {offsets = [3, 0], sizes = [1, 8], strides = [1, 1]} : vector<5x8xf32> to vector<1x8xf32>
    %47 = vector.shape_cast %46 : vector<1x8xf32> to vector<8xf32>
    %48 = vector.shape_cast %47 : vector<8xf32> to vector<1x8xf32>
    %49 = vector.broadcast %48 : vector<1x8xf32> to vector<8x8xf32>
    %50 = arith.mulf %22, %49 : vector<8x8xf32>
    %51 = vector.extract_strided_slice %30 {offsets = [4, 0], sizes = [1, 8], strides = [1, 1]} : vector<5x8xf32> to vector<1x8xf32>
    %52 = vector.shape_cast %51 : vector<1x8xf32> to vector<8xf32>
    %53 = vector.shape_cast %52 : vector<8xf32> to vector<1x8xf32>
    %54 = vector.broadcast %53 : vector<1x8xf32> to vector<8x8xf32>
    %55 = arith.mulf %22, %54 : vector<8x8xf32>
    %56 = tpu.concatenate %22, %35, %40, %45, %50, %55 in 0 : vector<8x8xf32>, vector<8x8xf32>, vector<8x8xf32>, vector<8x8xf32>, vector<8x8xf32>, vector<8x8xf32> -> vector<48x8xf32>
    %cst_34 = arith.constant dense<0.000000e+00> : vector<48x8xf32>
    %57 = tpu.matmul %56, %25, %cst_34 {dimension_numbers = #tpu.dot_dimension_numbers<[1], [1], [0], [0], [0, 0, 1, 0], [], []>} : vector<48x8xf32>, vector<8x8xf32>, vector<48x8xf32> -> vector<48x8xf32>
    %58 = vector.extract_strided_slice %57 {offsets = [0, 0], sizes = [8, 8], strides = [1, 1]} : vector<48x8xf32> to vector<8x8xf32>
    %59 = vector.broadcast %7 : vector<1x8xf32> to vector<8x8xf32>
    %60 = arith.addf %58, %59 : vector<8x8xf32>
    %61 = vector.extract_strided_slice %57 {offsets = [8, 0], sizes = [8, 8], strides = [1, 1]} : vector<48x8xf32> to vector<8x8xf32>
    %c4_i32 = arith.constant 4 : i32
    %62 = arith.muli %arg1, %c4_i32 : i32
    %c0_i32_35 = arith.constant 0 : i32
    %63 = arith.addi %62, %c0_i32_35 : i32
    %c0_36 = arith.constant 0 : index
    %64 = arith.index_cast %63 : i32 to index
    %65 = memref.load %arg8[%c0_36, %64] : memref<5x4xf32, #tpu.memory_space<smem>>
    %66 = vector.broadcast %65 : f32 to vector<8x8xf32>
    %67 = arith.addf %61, %66 : vector<8x8xf32>
    %c0_37 = arith.constant 0 : index
    %c0_38 = arith.constant 0 : index
    %c0_39 = arith.constant 0 : index
    %68 = vector.load %arg11[%c0_37, %c0_38, %c0_39] : memref<5x8x8xf32, #tpu.memory_space<vmem>>, vector<1x8x8xf32>
    %69 = vector.shape_cast %68 : vector<1x8x8xf32> to vector<8x8xf32>
    %70 = arith.mulf %67, %69 : vector<8x8xf32>
    %71 = arith.addf %60, %70 : vector<8x8xf32>
    %72 = vector.extract_strided_slice %57 {offsets = [16, 0], sizes = [8, 8], strides = [1, 1]} : vector<48x8xf32> to vector<8x8xf32>
    %c4_i32_40 = arith.constant 4 : i32
    %73 = arith.muli %arg1, %c4_i32_40 : i32
    %c0_i32_41 = arith.constant 0 : i32
    %74 = arith.addi %73, %c0_i32_41 : i32
    %c1_42 = arith.constant 1 : index
    %75 = arith.index_cast %74 : i32 to index
    %76 = memref.load %arg8[%c1_42, %75] : memref<5x4xf32, #tpu.memory_space<smem>>
    %77 = vector.broadcast %76 : f32 to vector<8x8xf32>
    %78 = arith.addf %72, %77 : vector<8x8xf32>
    %c1_43 = arith.constant 1 : index
    %c0_44 = arith.constant 0 : index
    %c0_45 = arith.constant 0 : index
    %79 = vector.load %arg11[%c1_43, %c0_44, %c0_45] : memref<5x8x8xf32, #tpu.memory_space<vmem>>, vector<1x8x8xf32>
    %80 = vector.shape_cast %79 : vector<1x8x8xf32> to vector<8x8xf32>
    %81 = arith.mulf %78, %80 : vector<8x8xf32>
    %82 = arith.addf %71, %81 : vector<8x8xf32>
    %83 = vector.extract_strided_slice %57 {offsets = [24, 0], sizes = [8, 8], strides = [1, 1]} : vector<48x8xf32> to vector<8x8xf32>
    %c4_i32_46 = arith.constant 4 : i32
    %84 = arith.muli %arg1, %c4_i32_46 : i32
    %c0_i32_47 = arith.constant 0 : i32
    %85 = arith.addi %84, %c0_i32_47 : i32
    %c2_48 = arith.constant 2 : index
    %86 = arith.index_cast %85 : i32 to index
    %87 = memref.load %arg8[%c2_48, %86] : memref<5x4xf32, #tpu.memory_space<smem>>
    %88 = vector.broadcast %87 : f32 to vector<8x8xf32>
    %89 = arith.addf %83, %88 : vector<8x8xf32>
    %c2_49 = arith.constant 2 : index
    %c0_50 = arith.constant 0 : index
    %c0_51 = arith.constant 0 : index
    %90 = vector.load %arg11[%c2_49, %c0_50, %c0_51] : memref<5x8x8xf32, #tpu.memory_space<vmem>>, vector<1x8x8xf32>
    %91 = vector.shape_cast %90 : vector<1x8x8xf32> to vector<8x8xf32>
    %92 = arith.mulf %89, %91 : vector<8x8xf32>
    %93 = arith.addf %82, %92 : vector<8x8xf32>
    %94 = vector.extract_strided_slice %57 {offsets = [32, 0], sizes = [8, 8], strides = [1, 1]} : vector<48x8xf32> to vector<8x8xf32>
    %c4_i32_52 = arith.constant 4 : i32
    %95 = arith.muli %arg1, %c4_i32_52 : i32
    %c0_i32_53 = arith.constant 0 : i32
    %96 = arith.addi %95, %c0_i32_53 : i32
    %c3 = arith.constant 3 : index
    %97 = arith.index_cast %96 : i32 to index
    %98 = memref.load %arg8[%c3, %97] : memref<5x4xf32, #tpu.memory_space<smem>>
    %99 = vector.broadcast %98 : f32 to vector<8x8xf32>
    %100 = arith.addf %94, %99 : vector<8x8xf32>
    %c3_54 = arith.constant 3 : index
    %c0_55 = arith.constant 0 : index
    %c0_56 = arith.constant 0 : index
    %101 = vector.load %arg11[%c3_54, %c0_55, %c0_56] : memref<5x8x8xf32, #tpu.memory_space<vmem>>, vector<1x8x8xf32>
    %102 = vector.shape_cast %101 : vector<1x8x8xf32> to vector<8x8xf32>
    %103 = arith.mulf %100, %102 : vector<8x8xf32>
    %104 = arith.addf %93, %103 : vector<8x8xf32>
    %105 = vector.extract_strided_slice %57 {offsets = [40, 0], sizes = [8, 8], strides = [1, 1]} : vector<48x8xf32> to vector<8x8xf32>
    %c4_i32_57 = arith.constant 4 : i32
    %106 = arith.muli %arg1, %c4_i32_57 : i32
    %c0_i32_58 = arith.constant 0 : i32
    %107 = arith.addi %106, %c0_i32_58 : i32
    %c4 = arith.constant 4 : index
    %108 = arith.index_cast %107 : i32 to index
    %109 = memref.load %arg8[%c4, %108] : memref<5x4xf32, #tpu.memory_space<smem>>
    %110 = vector.broadcast %109 : f32 to vector<8x8xf32>
    %111 = arith.addf %105, %110 : vector<8x8xf32>
    %c4_59 = arith.constant 4 : index
    %c0_60 = arith.constant 0 : index
    %c0_61 = arith.constant 0 : index
    %112 = vector.load %arg11[%c4_59, %c0_60, %c0_61] : memref<5x8x8xf32, #tpu.memory_space<vmem>>, vector<1x8x8xf32>
    %113 = vector.shape_cast %112 : vector<1x8x8xf32> to vector<8x8xf32>
    %114 = arith.mulf %111, %113 : vector<8x8xf32>
    %115 = arith.addf %104, %114 : vector<8x8xf32>
    %cst_62 = arith.constant dense<0xFF800000> : vector<8xf32>
    %116 = vector.multi_reduction <maximumf>, %115, %cst_62 [1] : vector<8x8xf32> to vector<8xf32>
    %117 = vector.shape_cast %116 : vector<8xf32> to vector<8x1xf32>
    %118 = vector.broadcast %117 : vector<8x1xf32> to vector<8x8xf32>
    %119 = arith.subf %115, %118 : vector<8x8xf32>
    %120 = math.exp %119 : vector<8x8xf32>
    %cst_63 = arith.constant dense<0.000000e+00> : vector<8xf32>
    %121 = vector.multi_reduction <add>, %120, %cst_63 [1] : vector<8x8xf32> to vector<8xf32>
    %122 = vector.shape_cast %121 : vector<8xf32> to vector<8x1xf32>
    %123 = vector.broadcast %122 : vector<8x1xf32> to vector<8x8xf32>
    %124 = arith.divf %120, %123 : vector<8x8xf32>
    %c0_64 = arith.constant 0 : index
    %c0_65 = arith.constant 0 : index
    %c0_66 = arith.constant 0 : index
    %c0_67 = arith.constant 0 : index
    %125 = vector.load %arg10[%c0_64, %c0_65, %c0_66, %c0_67] : memref<1x4x8x8xf32, #tpu.memory_space<vmem>>, vector<1x1x8x8xf32>
    %126 = vector.shape_cast %125 : vector<1x1x8x8xf32> to vector<8x8xf32>
    %127 = vector.shape_cast %124 : vector<8x8xf32> to vector<1x1x8x8xf32>
    tpu.vector_store %arg10[%c0_64, %c0_65, %c0_66, %c0_67], %127 {strides = array<i32>} : memref<1x4x8x8xf32, #tpu.memory_space<vmem>>, vector<1x1x8x8xf32>,
    %cst_68 = arith.constant dense<0.000000e+00> : vector<8x8xf32>
    %128 = tpu.matmul %124, %28, %cst_68 {dimension_numbers = #tpu.dot_dimension_numbers<[1], [0], [0], [1], [0, 0, 1, 1], [], []>} : vector<8x8xf32>, vector<8x8xf32>, vector<8x8xf32> -> vector<8x8xf32>
    %c0_69 = arith.constant 0 : index
    %c1_70 = arith.constant 1 : index
    %c0_71 = arith.constant 0 : index
    %c0_72 = arith.constant 0 : index
    %129 = vector.load %arg3[%c0_69, %c1_70, %c0_71, %c0_72] : memref<3x4x32x8xf32, #tpu.memory_space<vmem>>, vector<1x1x32x8xf32>
    %130 = vector.shape_cast %129 : vector<1x1x32x8xf32> to vector<32x8xf32>
    %c1_73 = arith.constant 1 : index
    %c1_74 = arith.constant 1 : index
    %c0_75 = arith.constant 0 : index
    %c0_76 = arith.constant 0 : index
    %131 = vector.load %arg3[%c1_73, %c1_74, %c0_75, %c0_76] : memref<3x4x32x8xf32, #tpu.memory_space<vmem>>, vector<1x1x32x8xf32>
    %132 = vector.shape_cast %131 : vector<1x1x32x8xf32> to vector<32x8xf32>
    %c2_77 = arith.constant 2 : index
    %c1_78 = arith.constant 1 : index
    %c0_79 = arith.constant 0 : index
    %c0_80 = arith.constant 0 : index
    %133 = vector.load %arg3[%c2_77, %c1_78, %c0_79, %c0_80] : memref<3x4x32x8xf32, #tpu.memory_space<vmem>>, vector<1x1x32x8xf32>
    %134 = vector.shape_cast %133 : vector<1x1x32x8xf32> to vector<32x8xf32>
    %c0_81 = arith.constant 0 : index
    %c1_82 = arith.constant 1 : index
    %c0_83 = arith.constant 0 : index
    %c0_84 = arith.constant 0 : index
    %135 = vector.load %arg4[%c0_81, %c1_82, %c0_83, %c0_84] : memref<3x4x1x8xf32, #tpu.memory_space<vmem>>, vector<1x1x1x8xf32>
    %136 = vector.shape_cast %135 : vector<1x1x1x8xf32> to vector<1x8xf32>
    %c1_85 = arith.constant 1 : index
    %c1_86 = arith.constant 1 : index
    %c0_87 = arith.constant 0 : index
    %c0_88 = arith.constant 0 : index
    %137 = vector.load %arg4[%c1_85, %c1_86, %c0_87, %c0_88] : memref<3x4x1x8xf32, #tpu.memory_space<vmem>>, vector<1x1x1x8xf32>
    %138 = vector.shape_cast %137 : vector<1x1x1x8xf32> to vector<1x8xf32>
    %c2_89 = arith.constant 2 : index
    %c1_90 = arith.constant 1 : index
    %c0_91 = arith.constant 0 : index
    %c0_92 = arith.constant 0 : index
    %139 = vector.load %arg4[%c2_89, %c1_90, %c0_91, %c0_92] : memref<3x4x1x8xf32, #tpu.memory_space<vmem>>, vector<1x1x1x8xf32>
    %140 = vector.shape_cast %139 : vector<1x1x1x8xf32> to vector<1x8xf32>
    %cst_93 = arith.constant dense<0.000000e+00> : vector<8x8xf32>
    %141 = tpu.matmul %4, %130, %cst_93 {dimension_numbers = #tpu.dot_dimension_numbers<[1], [0], [0], [1], [0, 0, 1, 1], [], []>} : vector<8x32xf32>, vector<32x8xf32>, vector<8x8xf32> -> vector<8x8xf32>
    %142 = vector.broadcast %136 : vector<1x8xf32> to vector<8x8xf32>
    %143 = arith.addf %141, %142 : vector<8x8xf32>
    %cst_94 = arith.constant dense<0.000000e+00> : vector<8x8xf32>
    %144 = tpu.matmul %4, %132, %cst_94 {dimension_numbers = #tpu.dot_dimension_numbers<[1], [0], [0], [1], [0, 0, 1, 1], [], []>} : vector<8x32xf32>, vector<32x8xf32>, vector<8x8xf32> -> vector<8x8xf32>
    %145 = vector.broadcast %138 : vector<1x8xf32> to vector<8x8xf32>
    %146 = arith.addf %144, %145 : vector<8x8xf32>
    %cst_95 = arith.constant dense<0.000000e+00> : vector<8x8xf32>
    %147 = tpu.matmul %4, %134, %cst_95 {dimension_numbers = #tpu.dot_dimension_numbers<[1], [0], [0], [1], [0, 0, 1, 1], [], []>} : vector<8x32xf32>, vector<32x8xf32>, vector<8x8xf32> -> vector<8x8xf32>
    %148 = vector.broadcast %140 : vector<1x8xf32> to vector<8x8xf32>
    %149 = arith.addf %147, %148 : vector<8x8xf32>
    %c1_96 = arith.constant 1 : index
    %c0_97 = arith.constant 0 : index
    %c0_98 = arith.constant 0 : index
    %150 = vector.load %arg6[%c1_96, %c0_97, %c0_98] : memref<4x5x8xf32, #tpu.memory_space<vmem>>, vector<1x5x8xf32>
    %151 = vector.shape_cast %150 : vector<1x5x8xf32> to vector<5x8xf32>
    %152 = vector.extract_strided_slice %151 {offsets = [0, 0], sizes = [1, 8], strides = [1, 1]} : vector<5x8xf32> to vector<1x8xf32>
    %153 = vector.shape_cast %152 : vector<1x8xf32> to vector<8xf32>
    %154 = vector.shape_cast %153 : vector<8xf32> to vector<1x8xf32>
    %155 = vector.broadcast %154 : vector<1x8xf32> to vector<8x8xf32>
    %156 = arith.mulf %143, %155 : vector<8x8xf32>
    %157 = vector.extract_strided_slice %151 {offsets = [1, 0], sizes = [1, 8], strides = [1, 1]} : vector<5x8xf32> to vector<1x8xf32>
    %158 = vector.shape_cast %157 : vector<1x8xf32> to vector<8xf32>
    %159 = vector.shape_cast %158 : vector<8xf32> to vector<1x8xf32>
    %160 = vector.broadcast %159 : vector<1x8xf32> to vector<8x8xf32>
    %161 = arith.mulf %143, %160 : vector<8x8xf32>
    %162 = vector.extract_strided_slice %151 {offsets = [2, 0], sizes = [1, 8], strides = [1, 1]} : vector<5x8xf32> to vector<1x8xf32>
    %163 = vector.shape_cast %162 : vector<1x8xf32> to vector<8xf32>
    %164 = vector.shape_cast %163 : vector<8xf32> to vector<1x8xf32>
    %165 = vector.broadcast %164 : vector<1x8xf32> to vector<8x8xf32>
    %166 = arith.mulf %143, %165 : vector<8x8xf32>
    %167 = vector.extract_strided_slice %151 {offsets = [3, 0], sizes = [1, 8], strides = [1, 1]} : vector<5x8xf32> to vector<1x8xf32>
    %168 = vector.shape_cast %167 : vector<1x8xf32> to vector<8xf32>
    %169 = vector.shape_cast %168 : vector<8xf32> to vector<1x8xf32>
    %170 = vector.broadcast %169 : vector<1x8xf32> to vector<8x8xf32>
    %171 = arith.mulf %143, %170 : vector<8x8xf32>
    %172 = vector.extract_strided_slice %151 {offsets = [4, 0], sizes = [1, 8], strides = [1, 1]} : vector<5x8xf32> to vector<1x8xf32>
    %173 = vector.shape_cast %172 : vector<1x8xf32> to vector<8xf32>
    %174 = vector.shape_cast %173 : vector<8xf32> to vector<1x8xf32>
    %175 = vector.broadcast %174 : vector<1x8xf32> to vector<8x8xf32>
    %176 = arith.mulf %143, %175 : vector<8x8xf32>
    %177 = tpu.concatenate %143, %156, %161, %166, %171, %176 in 0 : vector<8x8xf32>, vector<8x8xf32>, vector<8x8xf32>, vector<8x8xf32>, vector<8x8xf32>, vector<8x8xf32> -> vector<48x8xf32>
    %cst_99 = arith.constant dense<0.000000e+00> : vector<48x8xf32>
    %178 = tpu.matmul %177, %146, %cst_99 {dimension_numbers = #tpu.dot_dimension_numbers<[1], [1], [0], [0], [0, 0, 1, 0], [], []>} : vector<48x8xf32>, vector<8x8xf32>, vector<48x8xf32> -> vector<48x8xf32>
    %179 = vector.extract_strided_slice %178 {offsets = [0, 0], sizes = [8, 8], strides = [1, 1]} : vector<48x8xf32> to vector<8x8xf32>
    %180 = vector.broadcast %7 : vector<1x8xf32> to vector<8x8xf32>
    %181 = arith.addf %179, %180 : vector<8x8xf32>
    %182 = vector.extract_strided_slice %178 {offsets = [8, 0], sizes = [8, 8], strides = [1, 1]} : vector<48x8xf32> to vector<8x8xf32>
    %c4_i32_100 = arith.constant 4 : i32
    %183 = arith.muli %arg1, %c4_i32_100 : i32
    %c1_i32 = arith.constant 1 : i32
    %184 = arith.addi %183, %c1_i32 : i32
    %c0_101 = arith.constant 0 : index
    %185 = arith.index_cast %184 : i32 to index
    %186 = memref.load %arg8[%c0_101, %185] : memref<5x4xf32, #tpu.memory_space<smem>>
    %187 = vector.broadcast %186 : f32 to vector<8x8xf32>
    %188 = arith.addf %182, %187 : vector<8x8xf32>
    %c0_102 = arith.constant 0 : index
    %c0_103 = arith.constant 0 : index
    %c0_104 = arith.constant 0 : index
    %189 = vector.load %arg11[%c0_102, %c0_103, %c0_104] : memref<5x8x8xf32, #tpu.memory_space<vmem>>, vector<1x8x8xf32>
    %190 = vector.shape_cast %189 : vector<1x8x8xf32> to vector<8x8xf32>
    %191 = arith.mulf %188, %190 : vector<8x8xf32>
    %192 = arith.addf %181, %191 : vector<8x8xf32>
    %193 = vector.extract_strided_slice %178 {offsets = [16, 0], sizes = [8, 8], strides = [1, 1]} : vector<48x8xf32> to vector<8x8xf32>
    %c4_i32_105 = arith.constant 4 : i32
    %194 = arith.muli %arg1, %c4_i32_105 : i32
    %c1_i32_106 = arith.constant 1 : i32
    %195 = arith.addi %194, %c1_i32_106 : i32
    %c1_107 = arith.constant 1 : index
    %196 = arith.index_cast %195 : i32 to index
    %197 = memref.load %arg8[%c1_107, %196] : memref<5x4xf32, #tpu.memory_space<smem>>
    %198 = vector.broadcast %197 : f32 to vector<8x8xf32>
    %199 = arith.addf %193, %198 : vector<8x8xf32>
    %c1_108 = arith.constant 1 : index
    %c0_109 = arith.constant 0 : index
    %c0_110 = arith.constant 0 : index
    %200 = vector.load %arg11[%c1_108, %c0_109, %c0_110] : memref<5x8x8xf32, #tpu.memory_space<vmem>>, vector<1x8x8xf32>
    %201 = vector.shape_cast %200 : vector<1x8x8xf32> to vector<8x8xf32>
    %202 = arith.mulf %199, %201 : vector<8x8xf32>
    %203 = arith.addf %192, %202 : vector<8x8xf32>
    %204 = vector.extract_strided_slice %178 {offsets = [24, 0], sizes = [8, 8], strides = [1, 1]} : vector<48x8xf32> to vector<8x8xf32>
    %c4_i32_111 = arith.constant 4 : i32
    %205 = arith.muli %arg1, %c4_i32_111 : i32
    %c1_i32_112 = arith.constant 1 : i32
    %206 = arith.addi %205, %c1_i32_112 : i32
    %c2_113 = arith.constant 2 : index
    %207 = arith.index_cast %206 : i32 to index
    %208 = memref.load %arg8[%c2_113, %207] : memref<5x4xf32, #tpu.memory_space<smem>>
    %209 = vector.broadcast %208 : f32 to vector<8x8xf32>
    %210 = arith.addf %204, %209 : vector<8x8xf32>
    %c2_114 = arith.constant 2 : index
    %c0_115 = arith.constant 0 : index
    %c0_116 = arith.constant 0 : index
    %211 = vector.load %arg11[%c2_114, %c0_115, %c0_116] : memref<5x8x8xf32, #tpu.memory_space<vmem>>, vector<1x8x8xf32>
    %212 = vector.shape_cast %211 : vector<1x8x8xf32> to vector<8x8xf32>
    %213 = arith.mulf %210, %212 : vector<8x8xf32>
    %214 = arith.addf %203, %213 : vector<8x8xf32>
    %215 = vector.extract_strided_slice %178 {offsets = [32, 0], sizes = [8, 8], strides = [1, 1]} : vector<48x8xf32> to vector<8x8xf32>
    %c4_i32_117 = arith.constant 4 : i32
    %216 = arith.muli %arg1, %c4_i32_117 : i32
    %c1_i32_118 = arith.constant 1 : i32
    %217 = arith.addi %216, %c1_i32_118 : i32
    %c3_119 = arith.constant 3 : index
    %218 = arith.index_cast %217 : i32 to index
    %219 = memref.load %arg8[%c3_119, %218] : memref<5x4xf32, #tpu.memory_space<smem>>
    %220 = vector.broadcast %219 : f32 to vector<8x8xf32>
    %221 = arith.addf %215, %220 : vector<8x8xf32>
    %c3_120 = arith.constant 3 : index
    %c0_121 = arith.constant 0 : index
    %c0_122 = arith.constant 0 : index
    %222 = vector.load %arg11[%c3_120, %c0_121, %c0_122] : memref<5x8x8xf32, #tpu.memory_space<vmem>>, vector<1x8x8xf32>
    %223 = vector.shape_cast %222 : vector<1x8x8xf32> to vector<8x8xf32>
    %224 = arith.mulf %221, %223 : vector<8x8xf32>
    %225 = arith.addf %214, %224 : vector<8x8xf32>
    %226 = vector.extract_strided_slice %178 {offsets = [40, 0], sizes = [8, 8], strides = [1, 1]} : vector<48x8xf32> to vector<8x8xf32>
    %c4_i32_123 = arith.constant 4 : i32
    %227 = arith.muli %arg1, %c4_i32_123 : i32
    %c1_i32_124 = arith.constant 1 : i32
    %228 = arith.addi %227, %c1_i32_124 : i32
    %c4_125 = arith.constant 4 : index
    %229 = arith.index_cast %228 : i32 to index
    %230 = memref.load %arg8[%c4_125, %229] : memref<5x4xf32, #tpu.memory_space<smem>>
    %231 = vector.broadcast %230 : f32 to vector<8x8xf32>
    %232 = arith.addf %226, %231 : vector<8x8xf32>
    %c4_126 = arith.constant 4 : index
    %c0_127 = arith.constant 0 : index
    %c0_128 = arith.constant 0 : index
    %233 = vector.load %arg11[%c4_126, %c0_127, %c0_128] : memref<5x8x8xf32, #tpu.memory_space<vmem>>, vector<1x8x8xf32>
    %234 = vector.shape_cast %233 : vector<1x8x8xf32> to vector<8x8xf32>
    %235 = arith.mulf %232, %234 : vector<8x8xf32>
    %236 = arith.addf %225, %235 : vector<8x8xf32>
    %cst_129 = arith.constant dense<0xFF800000> : vector<8xf32>
    %237 = vector.multi_reduction <maximumf>, %236, %cst_129 [1] : vector<8x8xf32> to vector<8xf32>
    %238 = vector.shape_cast %237 : vector<8xf32> to vector<8x1xf32>
    %239 = vector.broadcast %238 : vector<8x1xf32> to vector<8x8xf32>
    %240 = arith.subf %236, %239 : vector<8x8xf32>
    %241 = math.exp %240 : vector<8x8xf32>
    %cst_130 = arith.constant dense<0.000000e+00> : vector<8xf32>
    %242 = vector.multi_reduction <add>, %241, %cst_130 [1] : vector<8x8xf32> to vector<8xf32>
    %243 = vector.shape_cast %242 : vector<8xf32> to vector<8x1xf32>
    %244 = vector.broadcast %243 : vector<8x1xf32> to vector<8x8xf32>
    %245 = arith.divf %241, %244 : vector<8x8xf32>
    %c0_131 = arith.constant 0 : index
    %c1_132 = arith.constant 1 : index
    %c0_133 = arith.constant 0 : index
    %c0_134 = arith.constant 0 : index
    %246 = vector.load %arg10[%c0_131, %c1_132, %c0_133, %c0_134] : memref<1x4x8x8xf32, #tpu.memory_space<vmem>>, vector<1x1x8x8xf32>
    %247 = vector.shape_cast %246 : vector<1x1x8x8xf32> to vector<8x8xf32>
    %248 = vector.shape_cast %245 : vector<8x8xf32> to vector<1x1x8x8xf32>
    tpu.vector_store %arg10[%c0_131, %c1_132, %c0_133, %c0_134], %248 {strides = array<i32>} : memref<1x4x8x8xf32, #tpu.memory_space<vmem>>, vector<1x1x8x8xf32>,
    %cst_135 = arith.constant dense<0.000000e+00> : vector<8x8xf32>
    %249 = tpu.matmul %245, %149, %cst_135 {dimension_numbers = #tpu.dot_dimension_numbers<[1], [0], [0], [1], [0, 0, 1, 1], [], []>} : vector<8x8xf32>, vector<8x8xf32>, vector<8x8xf32> -> vector<8x8xf32>
    %c0_136 = arith.constant 0 : index
    %c2_137 = arith.constant 2 : index
    %c0_138 = arith.constant 0 : index
    %c0_139 = arith.constant 0 : index
    %250 = vector.load %arg3[%c0_136, %c2_137, %c0_138, %c0_139] : memref<3x4x32x8xf32, #tpu.memory_space<vmem>>, vector<1x1x32x8xf32>
    %251 = vector.shape_cast %250 : vector<1x1x32x8xf32> to vector<32x8xf32>
    %c1_140 = arith.constant 1 : index
    %c2_141 = arith.constant 2 : index
    %c0_142 = arith.constant 0 : index
    %c0_143 = arith.constant 0 : index
    %252 = vector.load %arg3[%c1_140, %c2_141, %c0_142, %c0_143] : memref<3x4x32x8xf32, #tpu.memory_space<vmem>>, vector<1x1x32x8xf32>
    %253 = vector.shape_cast %252 : vector<1x1x32x8xf32> to vector<32x8xf32>
    %c2_144 = arith.constant 2 : index
    %c2_145 = arith.constant 2 : index
    %c0_146 = arith.constant 0 : index
    %c0_147 = arith.constant 0 : index
    %254 = vector.load %arg3[%c2_144, %c2_145, %c0_146, %c0_147] : memref<3x4x32x8xf32, #tpu.memory_space<vmem>>, vector<1x1x32x8xf32>
    %255 = vector.shape_cast %254 : vector<1x1x32x8xf32> to vector<32x8xf32>
    %c0_148 = arith.constant 0 : index
    %c2_149 = arith.constant 2 : index
    %c0_150 = arith.constant 0 : index
    %c0_151 = arith.constant 0 : index
    %256 = vector.load %arg4[%c0_148, %c2_149, %c0_150, %c0_151] : memref<3x4x1x8xf32, #tpu.memory_space<vmem>>, vector<1x1x1x8xf32>
    %257 = vector.shape_cast %256 : vector<1x1x1x8xf32> to vector<1x8xf32>
    %c1_152 = arith.constant 1 : index
    %c2_153 = arith.constant 2 : index
    %c0_154 = arith.constant 0 : index
    %c0_155 = arith.constant 0 : index
    %258 = vector.load %arg4[%c1_152, %c2_153, %c0_154, %c0_155] : memref<3x4x1x8xf32, #tpu.memory_space<vmem>>, vector<1x1x1x8xf32>
    %259 = vector.shape_cast %258 : vector<1x1x1x8xf32> to vector<1x8xf32>
    %c2_156 = arith.constant 2 : index
    %c2_157 = arith.constant 2 : index
    %c0_158 = arith.constant 0 : index
    %c0_159 = arith.constant 0 : index
    %260 = vector.load %arg4[%c2_156, %c2_157, %c0_158, %c0_159] : memref<3x4x1x8xf32, #tpu.memory_space<vmem>>, vector<1x1x1x8xf32>
    %261 = vector.shape_cast %260 : vector<1x1x1x8xf32> to vector<1x8xf32>
    %cst_160 = arith.constant dense<0.000000e+00> : vector<8x8xf32>
    %262 = tpu.matmul %4, %251, %cst_160 {dimension_numbers = #tpu.dot_dimension_numbers<[1], [0], [0], [1], [0, 0, 1, 1], [], []>} : vector<8x32xf32>, vector<32x8xf32>, vector<8x8xf32> -> vector<8x8xf32>
    %263 = vector.broadcast %257 : vector<1x8xf32> to vector<8x8xf32>
    %264 = arith.addf %262, %263 : vector<8x8xf32>
    %cst_161 = arith.constant dense<0.000000e+00> : vector<8x8xf32>
    %265 = tpu.matmul %4, %253, %cst_161 {dimension_numbers = #tpu.dot_dimension_numbers<[1], [0], [0], [1], [0, 0, 1, 1], [], []>} : vector<8x32xf32>, vector<32x8xf32>, vector<8x8xf32> -> vector<8x8xf32>
    %266 = vector.broadcast %259 : vector<1x8xf32> to vector<8x8xf32>
    %267 = arith.addf %265, %266 : vector<8x8xf32>
    %cst_162 = arith.constant dense<0.000000e+00> : vector<8x8xf32>
    %268 = tpu.matmul %4, %255, %cst_162 {dimension_numbers = #tpu.dot_dimension_numbers<[1], [0], [0], [1], [0, 0, 1, 1], [], []>} : vector<8x32xf32>, vector<32x8xf32>, vector<8x8xf32> -> vector<8x8xf32>
    %269 = vector.broadcast %261 : vector<1x8xf32> to vector<8x8xf32>
    %270 = arith.addf %268, %269 : vector<8x8xf32>
    %c2_163 = arith.constant 2 : index
    %c0_164 = arith.constant 0 : index
    %c0_165 = arith.constant 0 : index
    %271 = vector.load %arg6[%c2_163, %c0_164, %c0_165] : memref<4x5x8xf32, #tpu.memory_space<vmem>>, vector<1x5x8xf32>
    %272 = vector.shape_cast %271 : vector<1x5x8xf32> to vector<5x8xf32>
    %273 = vector.extract_strided_slice %272 {offsets = [0, 0], sizes = [1, 8], strides = [1, 1]} : vector<5x8xf32> to vector<1x8xf32>
    %274 = vector.shape_cast %273 : vector<1x8xf32> to vector<8xf32>
    %275 = vector.shape_cast %274 : vector<8xf32> to vector<1x8xf32>
    %276 = vector.broadcast %275 : vector<1x8xf32> to vector<8x8xf32>
    %277 = arith.mulf %264, %276 : vector<8x8xf32>
    %278 = vector.extract_strided_slice %272 {offsets = [1, 0], sizes = [1, 8], strides = [1, 1]} : vector<5x8xf32> to vector<1x8xf32>
    %279 = vector.shape_cast %278 : vector<1x8xf32> to vector<8xf32>
    %280 = vector.shape_cast %279 : vector<8xf32> to vector<1x8xf32>
    %281 = vector.broadcast %280 : vector<1x8xf32> to vector<8x8xf32>
    %282 = arith.mulf %264, %281 : vector<8x8xf32>
    %283 = vector.extract_strided_slice %272 {offsets = [2, 0], sizes = [1, 8], strides = [1, 1]} : vector<5x8xf32> to vector<1x8xf32>
    %284 = vector.shape_cast %283 : vector<1x8xf32> to vector<8xf32>
    %285 = vector.shape_cast %284 : vector<8xf32> to vector<1x8xf32>
    %286 = vector.broadcast %285 : vector<1x8xf32> to vector<8x8xf32>
    %287 = arith.mulf %264, %286 : vector<8x8xf32>
    %288 = vector.extract_strided_slice %272 {offsets = [3, 0], sizes = [1, 8], strides = [1, 1]} : vector<5x8xf32> to vector<1x8xf32>
    %289 = vector.shape_cast %288 : vector<1x8xf32> to vector<8xf32>
    %290 = vector.shape_cast %289 : vector<8xf32> to vector<1x8xf32>
    %291 = vector.broadcast %290 : vector<1x8xf32> to vector<8x8xf32>
    %292 = arith.mulf %264, %291 : vector<8x8xf32>
    %293 = vector.extract_strided_slice %272 {offsets = [4, 0], sizes = [1, 8], strides = [1, 1]} : vector<5x8xf32> to vector<1x8xf32>
    %294 = vector.shape_cast %293 : vector<1x8xf32> to vector<8xf32>
    %295 = vector.shape_cast %294 : vector<8xf32> to vector<1x8xf32>
    %296 = vector.broadcast %295 : vector<1x8xf32> to vector<8x8xf32>
    %297 = arith.mulf %264, %296 : vector<8x8xf32>
    %298 = tpu.concatenate %264, %277, %282, %287, %292, %297 in 0 : vector<8x8xf32>, vector<8x8xf32>, vector<8x8xf32>, vector<8x8xf32>, vector<8x8xf32>, vector<8x8xf32> -> vector<48x8xf32>
    %cst_166 = arith.constant dense<0.000000e+00> : vector<48x8xf32>
    %299 = tpu.matmul %298, %267, %cst_166 {dimension_numbers = #tpu.dot_dimension_numbers<[1], [1], [0], [0], [0, 0, 1, 0], [], []>} : vector<48x8xf32>, vector<8x8xf32>, vector<48x8xf32> -> vector<48x8xf32>
    %300 = vector.extract_strided_slice %299 {offsets = [0, 0], sizes = [8, 8], strides = [1, 1]} : vector<48x8xf32> to vector<8x8xf32>
    %301 = vector.broadcast %7 : vector<1x8xf32> to vector<8x8xf32>
    %302 = arith.addf %300, %301 : vector<8x8xf32>
    %303 = vector.extract_strided_slice %299 {offsets = [8, 0], sizes = [8, 8], strides = [1, 1]} : vector<48x8xf32> to vector<8x8xf32>
    %c4_i32_167 = arith.constant 4 : i32
    %304 = arith.muli %arg1, %c4_i32_167 : i32
    %c2_i32 = arith.constant 2 : i32
    %305 = arith.addi %304, %c2_i32 : i32
    %c0_168 = arith.constant 0 : index
    %306 = arith.index_cast %305 : i32 to index
    %307 = memref.load %arg8[%c0_168, %306] : memref<5x4xf32, #tpu.memory_space<smem>>
    %308 = vector.broadcast %307 : f32 to vector<8x8xf32>
    %309 = arith.addf %303, %308 : vector<8x8xf32>
    %c0_169 = arith.constant 0 : index
    %c0_170 = arith.constant 0 : index
    %c0_171 = arith.constant 0 : index
    %310 = vector.load %arg11[%c0_169, %c0_170, %c0_171] : memref<5x8x8xf32, #tpu.memory_space<vmem>>, vector<1x8x8xf32>
    %311 = vector.shape_cast %310 : vector<1x8x8xf32> to vector<8x8xf32>
    %312 = arith.mulf %309, %311 : vector<8x8xf32>
    %313 = arith.addf %302, %312 : vector<8x8xf32>
    %314 = vector.extract_strided_slice %299 {offsets = [16, 0], sizes = [8, 8], strides = [1, 1]} : vector<48x8xf32> to vector<8x8xf32>
    %c4_i32_172 = arith.constant 4 : i32
    %315 = arith.muli %arg1, %c4_i32_172 : i32
    %c2_i32_173 = arith.constant 2 : i32
    %316 = arith.addi %315, %c2_i32_173 : i32
    %c1_174 = arith.constant 1 : index
    %317 = arith.index_cast %316 : i32 to index
    %318 = memref.load %arg8[%c1_174, %317] : memref<5x4xf32, #tpu.memory_space<smem>>
    %319 = vector.broadcast %318 : f32 to vector<8x8xf32>
    %320 = arith.addf %314, %319 : vector<8x8xf32>
    %c1_175 = arith.constant 1 : index
    %c0_176 = arith.constant 0 : index
    %c0_177 = arith.constant 0 : index
    %321 = vector.load %arg11[%c1_175, %c0_176, %c0_177] : memref<5x8x8xf32, #tpu.memory_space<vmem>>, vector<1x8x8xf32>
    %322 = vector.shape_cast %321 : vector<1x8x8xf32> to vector<8x8xf32>
    %323 = arith.mulf %320, %322 : vector<8x8xf32>
    %324 = arith.addf %313, %323 : vector<8x8xf32>
    %325 = vector.extract_strided_slice %299 {offsets = [24, 0], sizes = [8, 8], strides = [1, 1]} : vector<48x8xf32> to vector<8x8xf32>
    %c4_i32_178 = arith.constant 4 : i32
    %326 = arith.muli %arg1, %c4_i32_178 : i32
    %c2_i32_179 = arith.constant 2 : i32
    %327 = arith.addi %326, %c2_i32_179 : i32
    %c2_180 = arith.constant 2 : index
    %328 = arith.index_cast %327 : i32 to index
    %329 = memref.load %arg8[%c2_180, %328] : memref<5x4xf32, #tpu.memory_space<smem>>
    %330 = vector.broadcast %329 : f32 to vector<8x8xf32>
    %331 = arith.addf %325, %330 : vector<8x8xf32>
    %c2_181 = arith.constant 2 : index
    %c0_182 = arith.constant 0 : index
    %c0_183 = arith.constant 0 : index
    %332 = vector.load %arg11[%c2_181, %c0_182, %c0_183] : memref<5x8x8xf32, #tpu.memory_space<vmem>>, vector<1x8x8xf32>
    %333 = vector.shape_cast %332 : vector<1x8x8xf32> to vector<8x8xf32>
    %334 = arith.mulf %331, %333 : vector<8x8xf32>
    %335 = arith.addf %324, %334 : vector<8x8xf32>
    %336 = vector.extract_strided_slice %299 {offsets = [32, 0], sizes = [8, 8], strides = [1, 1]} : vector<48x8xf32> to vector<8x8xf32>
    %c4_i32_184 = arith.constant 4 : i32
    %337 = arith.muli %arg1, %c4_i32_184 : i32
    %c2_i32_185 = arith.constant 2 : i32
    %338 = arith.addi %337, %c2_i32_185 : i32
    %c3_186 = arith.constant 3 : index
    %339 = arith.index_cast %338 : i32 to index
    %340 = memref.load %arg8[%c3_186, %339] : memref<5x4xf32, #tpu.memory_space<smem>>
    %341 = vector.broadcast %340 : f32 to vector<8x8xf32>
    %342 = arith.addf %336, %341 : vector<8x8xf32>
    %c3_187 = arith.constant 3 : index
    %c0_188 = arith.constant 0 : index
    %c0_189 = arith.constant 0 : index
    %343 = vector.load %arg11[%c3_187, %c0_188, %c0_189] : memref<5x8x8xf32, #tpu.memory_space<vmem>>, vector<1x8x8xf32>
    %344 = vector.shape_cast %343 : vector<1x8x8xf32> to vector<8x8xf32>
    %345 = arith.mulf %342, %344 : vector<8x8xf32>
    %346 = arith.addf %335, %345 : vector<8x8xf32>
    %347 = vector.extract_strided_slice %299 {offsets = [40, 0], sizes = [8, 8], strides = [1, 1]} : vector<48x8xf32> to vector<8x8xf32>
    %c4_i32_190 = arith.constant 4 : i32
    %348 = arith.muli %arg1, %c4_i32_190 : i32
    %c2_i32_191 = arith.constant 2 : i32
    %349 = arith.addi %348, %c2_i32_191 : i32
    %c4_192 = arith.constant 4 : index
    %350 = arith.index_cast %349 : i32 to index
    %351 = memref.load %arg8[%c4_192, %350] : memref<5x4xf32, #tpu.memory_space<smem>>
    %352 = vector.broadcast %351 : f32 to vector<8x8xf32>
    %353 = arith.addf %347, %352 : vector<8x8xf32>
    %c4_193 = arith.constant 4 : index
    %c0_194 = arith.constant 0 : index
    %c0_195 = arith.constant 0 : index
    %354 = vector.load %arg11[%c4_193, %c0_194, %c0_195] : memref<5x8x8xf32, #tpu.memory_space<vmem>>, vector<1x8x8xf32>
    %355 = vector.shape_cast %354 : vector<1x8x8xf32> to vector<8x8xf32>
    %356 = arith.mulf %353, %355 : vector<8x8xf32>
    %357 = arith.addf %346, %356 : vector<8x8xf32>
    %cst_196 = arith.constant dense<0xFF800000> : vector<8xf32>
    %358 = vector.multi_reduction <maximumf>, %357, %cst_196 [1] : vector<8x8xf32> to vector<8xf32>
    %359 = vector.shape_cast %358 : vector<8xf32> to vector<8x1xf32>
    %360 = vector.broadcast %359 : vector<8x1xf32> to vector<8x8xf32>
    %361 = arith.subf %357, %360 : vector<8x8xf32>
    %362 = math.exp %361 : vector<8x8xf32>
    %cst_197 = arith.constant dense<0.000000e+00> : vector<8xf32>
    %363 = vector.multi_reduction <add>, %362, %cst_197 [1] : vector<8x8xf32> to vector<8xf32>
    %364 = vector.shape_cast %363 : vector<8xf32> to vector<8x1xf32>
    %365 = vector.broadcast %364 : vector<8x1xf32> to vector<8x8xf32>
    %366 = arith.divf %362, %365 : vector<8x8xf32>
    %c0_198 = arith.constant 0 : index
    %c2_199 = arith.constant 2 : index
    %c0_200 = arith.constant 0 : index
    %c0_201 = arith.constant 0 : index
    %367 = vector.load %arg10[%c0_198, %c2_199, %c0_200, %c0_201] : memref<1x4x8x8xf32, #tpu.memory_space<vmem>>, vector<1x1x8x8xf32>
    %368 = vector.shape_cast %367 : vector<1x1x8x8xf32> to vector<8x8xf32>
    %369 = vector.shape_cast %366 : vector<8x8xf32> to vector<1x1x8x8xf32>
    tpu.vector_store %arg10[%c0_198, %c2_199, %c0_200, %c0_201], %369 {strides = array<i32>} : memref<1x4x8x8xf32, #tpu.memory_space<vmem>>, vector<1x1x8x8xf32>,
    %cst_202 = arith.constant dense<0.000000e+00> : vector<8x8xf32>
    %370 = tpu.matmul %366, %270, %cst_202 {dimension_numbers = #tpu.dot_dimension_numbers<[1], [0], [0], [1], [0, 0, 1, 1], [], []>} : vector<8x8xf32>, vector<8x8xf32>, vector<8x8xf32> -> vector<8x8xf32>
    %c0_203 = arith.constant 0 : index
    %c3_204 = arith.constant 3 : index
    %c0_205 = arith.constant 0 : index
    %c0_206 = arith.constant 0 : index
    %371 = vector.load %arg3[%c0_203, %c3_204, %c0_205, %c0_206] : memref<3x4x32x8xf32, #tpu.memory_space<vmem>>, vector<1x1x32x8xf32>
    %372 = vector.shape_cast %371 : vector<1x1x32x8xf32> to vector<32x8xf32>
    %c1_207 = arith.constant 1 : index
    %c3_208 = arith.constant 3 : index
    %c0_209 = arith.constant 0 : index
    %c0_210 = arith.constant 0 : index
    %373 = vector.load %arg3[%c1_207, %c3_208, %c0_209, %c0_210] : memref<3x4x32x8xf32, #tpu.memory_space<vmem>>, vector<1x1x32x8xf32>
    %374 = vector.shape_cast %373 : vector<1x1x32x8xf32> to vector<32x8xf32>
    %c2_211 = arith.constant 2 : index
    %c3_212 = arith.constant 3 : index
    %c0_213 = arith.constant 0 : index
    %c0_214 = arith.constant 0 : index
    %375 = vector.load %arg3[%c2_211, %c3_212, %c0_213, %c0_214] : memref<3x4x32x8xf32, #tpu.memory_space<vmem>>, vector<1x1x32x8xf32>
    %376 = vector.shape_cast %375 : vector<1x1x32x8xf32> to vector<32x8xf32>
    %c0_215 = arith.constant 0 : index
    %c3_216 = arith.constant 3 : index
    %c0_217 = arith.constant 0 : index
    %c0_218 = arith.constant 0 : index
    %377 = vector.load %arg4[%c0_215, %c3_216, %c0_217, %c0_218] : memref<3x4x1x8xf32, #tpu.memory_space<vmem>>, vector<1x1x1x8xf32>
    %378 = vector.shape_cast %377 : vector<1x1x1x8xf32> to vector<1x8xf32>
    %c1_219 = arith.constant 1 : index
    %c3_220 = arith.constant 3 : index
    %c0_221 = arith.constant 0 : index
    %c0_222 = arith.constant 0 : index
    %379 = vector.load %arg4[%c1_219, %c3_220, %c0_221, %c0_222] : memref<3x4x1x8xf32, #tpu.memory_space<vmem>>, vector<1x1x1x8xf32>
    %380 = vector.shape_cast %379 : vector<1x1x1x8xf32> to vector<1x8xf32>
    %c2_223 = arith.constant 2 : index
    %c3_224 = arith.constant 3 : index
    %c0_225 = arith.constant 0 : index
    %c0_226 = arith.constant 0 : index
    %381 = vector.load %arg4[%c2_223, %c3_224, %c0_225, %c0_226] : memref<3x4x1x8xf32, #tpu.memory_space<vmem>>, vector<1x1x1x8xf32>
    %382 = vector.shape_cast %381 : vector<1x1x1x8xf32> to vector<1x8xf32>
    %cst_227 = arith.constant dense<0.000000e+00> : vector<8x8xf32>
    %383 = tpu.matmul %4, %372, %cst_227 {dimension_numbers = #tpu.dot_dimension_numbers<[1], [0], [0], [1], [0, 0, 1, 1], [], []>} : vector<8x32xf32>, vector<32x8xf32>, vector<8x8xf32> -> vector<8x8xf32>
    %384 = vector.broadcast %378 : vector<1x8xf32> to vector<8x8xf32>
    %385 = arith.addf %383, %384 : vector<8x8xf32>
    %cst_228 = arith.constant dense<0.000000e+00> : vector<8x8xf32>
    %386 = tpu.matmul %4, %374, %cst_228 {dimension_numbers = #tpu.dot_dimension_numbers<[1], [0], [0], [1], [0, 0, 1, 1], [], []>} : vector<8x32xf32>, vector<32x8xf32>, vector<8x8xf32> -> vector<8x8xf32>
    %387 = vector.broadcast %380 : vector<1x8xf32> to vector<8x8xf32>
    %388 = arith.addf %386, %387 : vector<8x8xf32>
    %cst_229 = arith.constant dense<0.000000e+00> : vector<8x8xf32>
    %389 = tpu.matmul %4, %376, %cst_229 {dimension_numbers = #tpu.dot_dimension_numbers<[1], [0], [0], [1], [0, 0, 1, 1], [], []>} : vector<8x32xf32>, vector<32x8xf32>, vector<8x8xf32> -> vector<8x8xf32>
    %390 = vector.broadcast %382 : vector<1x8xf32> to vector<8x8xf32>
    %391 = arith.addf %389, %390 : vector<8x8xf32>
    %c3_230 = arith.constant 3 : index
    %c0_231 = arith.constant 0 : index
    %c0_232 = arith.constant 0 : index
    %392 = vector.load %arg6[%c3_230, %c0_231, %c0_232] : memref<4x5x8xf32, #tpu.memory_space<vmem>>, vector<1x5x8xf32>
    %393 = vector.shape_cast %392 : vector<1x5x8xf32> to vector<5x8xf32>
    %394 = vector.extract_strided_slice %393 {offsets = [0, 0], sizes = [1, 8], strides = [1, 1]} : vector<5x8xf32> to vector<1x8xf32>
    %395 = vector.shape_cast %394 : vector<1x8xf32> to vector<8xf32>
    %396 = vector.shape_cast %395 : vector<8xf32> to vector<1x8xf32>
    %397 = vector.broadcast %396 : vector<1x8xf32> to vector<8x8xf32>
    %398 = arith.mulf %385, %397 : vector<8x8xf32>
    %399 = vector.extract_strided_slice %393 {offsets = [1, 0], sizes = [1, 8], strides = [1, 1]} : vector<5x8xf32> to vector<1x8xf32>
    %400 = vector.shape_cast %399 : vector<1x8xf32> to vector<8xf32>
    %401 = vector.shape_cast %400 : vector<8xf32> to vector<1x8xf32>
    %402 = vector.broadcast %401 : vector<1x8xf32> to vector<8x8xf32>
    %403 = arith.mulf %385, %402 : vector<8x8xf32>
    %404 = vector.extract_strided_slice %393 {offsets = [2, 0], sizes = [1, 8], strides = [1, 1]} : vector<5x8xf32> to vector<1x8xf32>
    %405 = vector.shape_cast %404 : vector<1x8xf32> to vector<8xf32>
    %406 = vector.shape_cast %405 : vector<8xf32> to vector<1x8xf32>
    %407 = vector.broadcast %406 : vector<1x8xf32> to vector<8x8xf32>
    %408 = arith.mulf %385, %407 : vector<8x8xf32>
    %409 = vector.extract_strided_slice %393 {offsets = [3, 0], sizes = [1, 8], strides = [1, 1]} : vector<5x8xf32> to vector<1x8xf32>
    %410 = vector.shape_cast %409 : vector<1x8xf32> to vector<8xf32>
    %411 = vector.shape_cast %410 : vector<8xf32> to vector<1x8xf32>
    %412 = vector.broadcast %411 : vector<1x8xf32> to vector<8x8xf32>
    %413 = arith.mulf %385, %412 : vector<8x8xf32>
    %414 = vector.extract_strided_slice %393 {offsets = [4, 0], sizes = [1, 8], strides = [1, 1]} : vector<5x8xf32> to vector<1x8xf32>
    %415 = vector.shape_cast %414 : vector<1x8xf32> to vector<8xf32>
    %416 = vector.shape_cast %415 : vector<8xf32> to vector<1x8xf32>
    %417 = vector.broadcast %416 : vector<1x8xf32> to vector<8x8xf32>
    %418 = arith.mulf %385, %417 : vector<8x8xf32>
    %419 = tpu.concatenate %385, %398, %403, %408, %413, %418 in 0 : vector<8x8xf32>, vector<8x8xf32>, vector<8x8xf32>, vector<8x8xf32>, vector<8x8xf32>, vector<8x8xf32> -> vector<48x8xf32>
    %cst_233 = arith.constant dense<0.000000e+00> : vector<48x8xf32>
    %420 = tpu.matmul %419, %388, %cst_233 {dimension_numbers = #tpu.dot_dimension_numbers<[1], [1], [0], [0], [0, 0, 1, 0], [], []>} : vector<48x8xf32>, vector<8x8xf32>, vector<48x8xf32> -> vector<48x8xf32>
    %421 = vector.extract_strided_slice %420 {offsets = [0, 0], sizes = [8, 8], strides = [1, 1]} : vector<48x8xf32> to vector<8x8xf32>
    %422 = vector.broadcast %7 : vector<1x8xf32> to vector<8x8xf32>
    %423 = arith.addf %421, %422 : vector<8x8xf32>
    %424 = vector.extract_strided_slice %420 {offsets = [8, 0], sizes = [8, 8], strides = [1, 1]} : vector<48x8xf32> to vector<8x8xf32>
    %c4_i32_234 = arith.constant 4 : i32
    %425 = arith.muli %arg1, %c4_i32_234 : i32
    %c3_i32 = arith.constant 3 : i32
    %426 = arith.addi %425, %c3_i32 : i32
    %c0_235 = arith.constant 0 : index
    %427 = arith.index_cast %426 : i32 to index
    %428 = memref.load %arg8[%c0_235, %427] : memref<5x4xf32, #tpu.memory_space<smem>>
    %429 = vector.broadcast %428 : f32 to vector<8x8xf32>
    %430 = arith.addf %424, %429 : vector<8x8xf32>
    %c0_236 = arith.constant 0 : index
    %c0_237 = arith.constant 0 : index
    %c0_238 = arith.constant 0 : index
    %431 = vector.load %arg11[%c0_236, %c0_237, %c0_238] : memref<5x8x8xf32, #tpu.memory_space<vmem>>, vector<1x8x8xf32>
    %432 = vector.shape_cast %431 : vector<1x8x8xf32> to vector<8x8xf32>
    %433 = arith.mulf %430, %432 : vector<8x8xf32>
    %434 = arith.addf %423, %433 : vector<8x8xf32>
    %435 = vector.extract_strided_slice %420 {offsets = [16, 0], sizes = [8, 8], strides = [1, 1]} : vector<48x8xf32> to vector<8x8xf32>
    %c4_i32_239 = arith.constant 4 : i32
    %436 = arith.muli %arg1, %c4_i32_239 : i32
    %c3_i32_240 = arith.constant 3 : i32
    %437 = arith.addi %436, %c3_i32_240 : i32
    %c1_241 = arith.constant 1 : index
    %438 = arith.index_cast %437 : i32 to index
    %439 = memref.load %arg8[%c1_241, %438] : memref<5x4xf32, #tpu.memory_space<smem>>
    %440 = vector.broadcast %439 : f32 to vector<8x8xf32>
    %441 = arith.addf %435, %440 : vector<8x8xf32>
    %c1_242 = arith.constant 1 : index
    %c0_243 = arith.constant 0 : index
    %c0_244 = arith.constant 0 : index
    %442 = vector.load %arg11[%c1_242, %c0_243, %c0_244] : memref<5x8x8xf32, #tpu.memory_space<vmem>>, vector<1x8x8xf32>
    %443 = vector.shape_cast %442 : vector<1x8x8xf32> to vector<8x8xf32>
    %444 = arith.mulf %441, %443 : vector<8x8xf32>
    %445 = arith.addf %434, %444 : vector<8x8xf32>
    %446 = vector.extract_strided_slice %420 {offsets = [24, 0], sizes = [8, 8], strides = [1, 1]} : vector<48x8xf32> to vector<8x8xf32>
    %c4_i32_245 = arith.constant 4 : i32
    %447 = arith.muli %arg1, %c4_i32_245 : i32
    %c3_i32_246 = arith.constant 3 : i32
    %448 = arith.addi %447, %c3_i32_246 : i32
    %c2_247 = arith.constant 2 : index
    %449 = arith.index_cast %448 : i32 to index
    %450 = memref.load %arg8[%c2_247, %449] : memref<5x4xf32, #tpu.memory_space<smem>>
    %451 = vector.broadcast %450 : f32 to vector<8x8xf32>
    %452 = arith.addf %446, %451 : vector<8x8xf32>
    %c2_248 = arith.constant 2 : index
    %c0_249 = arith.constant 0 : index
    %c0_250 = arith.constant 0 : index
    %453 = vector.load %arg11[%c2_248, %c0_249, %c0_250] : memref<5x8x8xf32, #tpu.memory_space<vmem>>, vector<1x8x8xf32>
    %454 = vector.shape_cast %453 : vector<1x8x8xf32> to vector<8x8xf32>
    %455 = arith.mulf %452, %454 : vector<8x8xf32>
    %456 = arith.addf %445, %455 : vector<8x8xf32>
    %457 = vector.extract_strided_slice %420 {offsets = [32, 0], sizes = [8, 8], strides = [1, 1]} : vector<48x8xf32> to vector<8x8xf32>
    %c4_i32_251 = arith.constant 4 : i32
    %458 = arith.muli %arg1, %c4_i32_251 : i32
    %c3_i32_252 = arith.constant 3 : i32
    %459 = arith.addi %458, %c3_i32_252 : i32
    %c3_253 = arith.constant 3 : index
    %460 = arith.index_cast %459 : i32 to index
    %461 = memref.load %arg8[%c3_253, %460] : memref<5x4xf32, #tpu.memory_space<smem>>
    %462 = vector.broadcast %461 : f32 to vector<8x8xf32>
    %463 = arith.addf %457, %462 : vector<8x8xf32>
    %c3_254 = arith.constant 3 : index
    %c0_255 = arith.constant 0 : index
    %c0_256 = arith.constant 0 : index
    %464 = vector.load %arg11[%c3_254, %c0_255, %c0_256] : memref<5x8x8xf32, #tpu.memory_space<vmem>>, vector<1x8x8xf32>
    %465 = vector.shape_cast %464 : vector<1x8x8xf32> to vector<8x8xf32>
    %466 = arith.mulf %463, %465 : vector<8x8xf32>
    %467 = arith.addf %456, %466 : vector<8x8xf32>
    %468 = vector.extract_strided_slice %420 {offsets = [40, 0], sizes = [8, 8], strides = [1, 1]} : vector<48x8xf32> to vector<8x8xf32>
    %c4_i32_257 = arith.constant 4 : i32
    %469 = arith.muli %arg1, %c4_i32_257 : i32
    %c3_i32_258 = arith.constant 3 : i32
    %470 = arith.addi %469, %c3_i32_258 : i32
    %c4_259 = arith.constant 4 : index
    %471 = arith.index_cast %470 : i32 to index
    %472 = memref.load %arg8[%c4_259, %471] : memref<5x4xf32, #tpu.memory_space<smem>>
    %473 = vector.broadcast %472 : f32 to vector<8x8xf32>
    %474 = arith.addf %468, %473 : vector<8x8xf32>
    %c4_260 = arith.constant 4 : index
    %c0_261 = arith.constant 0 : index
    %c0_262 = arith.constant 0 : index
    %475 = vector.load %arg11[%c4_260, %c0_261, %c0_262] : memref<5x8x8xf32, #tpu.memory_space<vmem>>, vector<1x8x8xf32>
    %476 = vector.shape_cast %475 : vector<1x8x8xf32> to vector<8x8xf32>
    %477 = arith.mulf %474, %476 : vector<8x8xf32>
    %478 = arith.addf %467, %477 : vector<8x8xf32>
    %cst_263 = arith.constant dense<0xFF800000> : vector<8xf32>
    %479 = vector.multi_reduction <maximumf>, %478, %cst_263 [1] : vector<8x8xf32> to vector<8xf32>
    %480 = vector.shape_cast %479 : vector<8xf32> to vector<8x1xf32>
    %481 = vector.broadcast %480 : vector<8x1xf32> to vector<8x8xf32>
    %482 = arith.subf %478, %481 : vector<8x8xf32>
    %483 = math.exp %482 : vector<8x8xf32>
    %cst_264 = arith.constant dense<0.000000e+00> : vector<8xf32>
    %484 = vector.multi_reduction <add>, %483, %cst_264 [1] : vector<8x8xf32> to vector<8xf32>
    %485 = vector.shape_cast %484 : vector<8xf32> to vector<8x1xf32>
    %486 = vector.broadcast %485 : vector<8x1xf32> to vector<8x8xf32>
    %487 = arith.divf %483, %486 : vector<8x8xf32>
    %c0_265 = arith.constant 0 : index
    %c3_266 = arith.constant 3 : index
    %c0_267 = arith.constant 0 : index
    %c0_268 = arith.constant 0 : index
    %488 = vector.load %arg10[%c0_265, %c3_266, %c0_267, %c0_268] : memref<1x4x8x8xf32, #tpu.memory_space<vmem>>, vector<1x1x8x8xf32>
    %489 = vector.shape_cast %488 : vector<1x1x8x8xf32> to vector<8x8xf32>
    %490 = vector.shape_cast %487 : vector<8x8xf32> to vector<1x1x8x8xf32>
    tpu.vector_store %arg10[%c0_265, %c3_266, %c0_267, %c0_268], %490 {strides = array<i32>} : memref<1x4x8x8xf32, #tpu.memory_space<vmem>>, vector<1x1x8x8xf32>,
    %cst_269 = arith.constant dense<0.000000e+00> : vector<8x8xf32>
    %491 = tpu.matmul %487, %391, %cst_269 {dimension_numbers = #tpu.dot_dimension_numbers<[1], [0], [0], [1], [0, 0, 1, 1], [], []>} : vector<8x8xf32>, vector<8x8xf32>, vector<8x8xf32> -> vector<8x8xf32>
    %492 = tpu.concatenate %128, %249, %370, %491 in 1 : vector<8x8xf32>, vector<8x8xf32>, vector<8x8xf32>, vector<8x8xf32> -> vector<8x32xf32>
    %c0_270 = arith.constant 0 : index
    %c0_271 = arith.constant 0 : index
    %c0_272 = arith.constant 0 : index
    %493 = vector.load %arg9[%c0_270, %c0_271, %c0_272] : memref<1x8x32xf32, #tpu.memory_space<vmem>>, vector<1x8x32xf32>
    %494 = vector.shape_cast %493 : vector<1x8x32xf32> to vector<8x32xf32>
    %495 = vector.shape_cast %492 : vector<8x32xf32> to vector<1x8x32xf32>
    tpu.vector_store %arg9[%c0_270, %c0_271, %c0_272], %495 {strides = array<i32>} : memref<1x8x32xf32, #tpu.memory_space<vmem>>, vector<1x8x32xf32>,
    return
  }
  func.func @transform_0(%arg0: i32, %arg1: i32) -> (i32, i32, i32) {
    %c0_i32 = arith.constant 0 : i32
    %c0_i32_0 = arith.constant 0 : i32
    %c0_i32_1 = arith.constant 0 : i32
    return %arg0, %c0_i32, %c0_i32_0 : i32, i32, i32
  }
  func.func @transform_1(%arg0: i32, %arg1: i32) -> (i32, i32, i32, i32) {
    %c0_i32 = arith.constant 0 : i32
    %c0_i32_0 = arith.constant 0 : i32
    %c0_i32_1 = arith.constant 0 : i32
    %c0_i32_2 = arith.constant 0 : i32
    return %c0_i32, %arg1, %c0_i32_0, %c0_i32_1 : i32, i32, i32, i32
  }
  func.func @transform_2(%arg0: i32, %arg1: i32) -> (i32, i32, i32, i32) {
    %c0_i32 = arith.constant 0 : i32
    %c0_i32_0 = arith.constant 0 : i32
    %c0_i32_1 = arith.constant 0 : i32
    %c0_i32_2 = arith.constant 0 : i32
    return %c0_i32, %arg1, %c0_i32_0, %c0_i32_1 : i32, i32, i32, i32
  }
  func.func @transform_3(%arg0: i32, %arg1: i32) -> (i32, i32, i32, i32) {
    %c0_i32 = arith.constant 0 : i32
    %c0_i32_0 = arith.constant 0 : i32
    %c0_i32_1 = arith.constant 0 : i32
    %c0_i32_2 = arith.constant 0 : i32
    return %arg0, %c0_i32, %c0_i32_0, %c0_i32_1 : i32, i32, i32, i32
  }
  func.func @transform_4(%arg0: i32, %arg1: i32) -> (i32, i32, i32) {
    %c0_i32 = arith.constant 0 : i32
    %c0_i32_0 = arith.constant 0 : i32
    %c0_i32_1 = arith.constant 0 : i32
    return %arg1, %c0_i32, %c0_i32_0 : i32, i32, i32
  }
  func.func @transform_5(%arg0: i32, %arg1: i32) -> (i32, i32, i32, i32, i32) {
    %c0_i32 = arith.constant 0 : i32
    %c0_i32_0 = arith.constant 0 : i32
    %c0_i32_1 = arith.constant 0 : i32
    %c0_i32_2 = arith.constant 0 : i32
    %c0_i32_3 = arith.constant 0 : i32
    return %c0_i32, %arg0, %c0_i32_0, %c0_i32_1, %c0_i32_2 : i32, i32, i32, i32, i32
  }
  func.func @transform_6(%arg0: i32, %arg1: i32) -> (i32, i32) {
    %c0_i32 = arith.constant 0 : i32
    %c0_i32_0 = arith.constant 0 : i32
    %c0_i32_1 = arith.constant 0 : i32
    return %c0_i32, %c0_i32_0 : i32, i32
  }
  func.func @transform_7(%arg0: i32, %arg1: i32) -> (i32, i32, i32) {
    %c0_i32 = arith.constant 0 : i32
    %c0_i32_0 = arith.constant 0 : i32
    return %arg0, %c0_i32, %arg1 : i32, i32, i32
  }
  func.func @transform_8(%arg0: i32, %arg1: i32) -> (i32, i32, i32, i32) {
    %c0_i32 = arith.constant 0 : i32
    %c0_i32_0 = arith.constant 0 : i32
    %c0_i32_1 = arith.constant 0 : i32
    return %arg0, %arg1, %c0_i32, %c0_i32_0 : i32, i32, i32, i32
  }
}

</mosaic_0001>

<bundles_post_ra>
// kernel: tpu_custom_call.1
= control target key start
LH: loop header
LB: loop body
LE: loop exit
PB: predicated region body
PF: predicated region fallthrough
CT: control target
= control target key end

     0   :  { %14 = vsyncpa [#allocation6], 0  ;;  %s4323_s0 = inlined_call_operand.vmem [shape: f32[2,8,32], index: 0, kind: input, shape index: {}]   ;;  %s4324_s1 = inlined_call_operand.vmem [shape: f32[3,4,32,8], index: 1, kind: input, shape index: {}]   ;;  %s4325_s2 = inlined_call_operand.vmem [shape: f32[3,4,1,8], index: 2, kind: input, shape index: {}]   ;;  %s4326_s3 = inlined_call_operand.vmem [shape: f32[2,1,1,8], index: 3, kind: input, shape index: {}]   ;;  %s4327_s4 = inlined_call_operand.vmem [shape: f32[4,5,8], index: 4, kind: input, shape index: {}]   ;;  %s4328_s5 = inlined_call_operand.vmem [shape: s8[5,2,1,8,8], index: 5, kind: input, shape index: {}]   ;;  %s4329_s6 = inlined_call_operand.vmem [shape: f32[5,4], index: 6, kind: input, shape index: {}]   ;;  %s4330_s7 = inlined_call_operand.hbm [shape: f32[2,8,32], index: 7, kind: output, shape index: {0}]   ;;  %s4331_s8 = inlined_call_operand.hbm [shape: f32[2,4,8,8], index: 8, kind: output, shape index: {1}]  }
   0x1   :  { %15 = vsyncpa [#allocation5], 0 }
   0x2   :  { %17 = vsyncpa [#allocation5 + $0x1], 0 }
   0x3   :  { %18 = vsyncpa [#allocation9], 0 }
   0x4   :  { %20 = vsyncpa [#allocation9 + $0x1], 0  ;;  %s3708_s27 = smov 0   ;;  %s3710_s28 = smov 0  }
   0x5   :  { %s3712_s29 = smov 0   ;;  %s3714_s30 = smov 0  }
   0x6   :  { %s3716_s9 = smov 0   ;;  %s3718_s10 = smov 0  }
   0x7 LB: > { %s2890_s11 = sadd.s32 4294967295, %s3651_s10   ;;  %s2891_s12 = sadd.s32 4294967294, %s3651_s10   ;;  %s3651_s10 = sphi %s3718_s10, %s26_s10   ;;  %s3647_s9 = sphi %s3716_s9, %s4345_s9   ;;  %s3643_s30 = sphi %s3714_s30, %s4344_s30   ;;  %s3639_s29 = sphi %s3712_s29, %s4343_s29   ;;  %s3635_s28 = sphi %s3710_s28, %s4342_s28   ;;  %s3631_s27 = sphi %s3708_s27, %s4341_s27  }
   0x8   : > { %s38_s13 = sadd.s32 1, %s3647_s9  ;;  %s175_s14 = sadd.s32 1, %s3639_s29 }
   0x9   : > { %p40_p0 = scmp.ge.s32.totalorder %s38_s13, 2  ;;  %p182_p1 = scmp.ne.s32.totalorder %s3639_s29, %s3635_s28 }
   0xa   : > { %p183_p2 = scmp.eq.s32.totalorder %s3651_s10, 0  ;;  %p235_p3 = scmp.eq.s32.totalorder %s2890_s11, 1 }
   0xb   : > { %s4347_s13 = smov (%p40_p0, %s38_s13), 0  ;;  %p240_p6 = scmp.ne.s32.totalorder %s3635_s28, %s3631_s27 }
   0xc   : > { %p3747_p4 = por %p183_p2, %p182_p1  ;;  %p3751_p5 = por %p235_p3, %p182_p1 }
   0xd   : > { %s172_s17 = ssub.s32 %s3647_s9, %s4347_s13  ;;  %p241_p8 = scmp.eq.s32.totalorder %s2891_s12, 1 }
   0xe   : > { %s4334_s16 = scalar_select %p3751_p5, 1, 0 }
   0xf   : > { %p173_p7 = scmp.eq.s32.totalorder %s172_s17, 0  ;;  %p2892_p9 = scmp.ge.s32.totalorder %s3651_s10, 1 }
  0x10   : > { %p276_p10 = scmp.lt.s32.totalorder %s3651_s10, 3  ;;  %p3764_p11 = por %p241_p8, %p240_p6 }
  0x11   : > { %s3762_s18 = scalar_select %p173_p7, %s3639_s29, %s175_s14  }
  0x12   : > { %s4335_s19 = scalar_select %p3764_p11, 1, 0 }
  0x13   : > { %p3768_p12 = pnand %p2892_p9, %p276_p10  ;;  %p3772_p13 = scmp.eq.s32.totalorder %s2890_s11, 0 }
  0x14   : > { %s316_s24 = sshll.u32 %s4329_s6, 4  ;;  %s317_s24 = int_to_ptr.vmem [resolvable:$true] %s316_s24 }
  0x15   : > { %p3436_p0 = pneg %p3768_p12  ;;  %s3522_s25 = scalar_lea.vmem %s317_s24, 128 }
  0x16   : > { %p3523_p2 = scmp.ne.s32.totalorder %s317_s24, %s3522_s25  ;;  %p3530_p8 = scmp.lt.s32.totalorder %s317_s24, %s317_s24 }
  0x17   : > { %p3437_p1 = pnand %p3772_p13, %p3436_p0  ;;  %p3531_p9 = scmp.lt.s32.totalorder %s3522_s25, %s3522_s25 }
  0x19   : > { %p3524_p3 = pneg %p3437_p1  ;;  %p3532_p10 = por %p3531_p9, %p3530_p8 }
  0x1b   : > { %p3525_p6 = pnand %p3524_p3, %p3523_p2 }
  0x1d   : > { %p3526_p7 = pneg %p3525_p6 }
  0x1f   : > { %p3533_p11 = pnand %p3532_p10, %p3526_p7 }
  0x21   : > { %3536 = shalt.err (!%p3533_p11)
}
  0x22   : > { %s3653_s26 = smov [#allocation4]   ;;  %p2897_p5 = scmp.ge.s32.totalorder %s3651_s10, 2 }
  0x23   : > { %3439 = dma.vmem_to_smem (!%p3437_p1), %s317_s24, 128, %s3653_s26, [#allocation6]  }
  0x24   : > { %323 = sbr.rel (%p2897_p5) target bundleno = 51 (0x33), region = 32 }
  0x2b   : > { %339 = sbr.rel (!%p3747_p4) target bundleno = 51 (0x33), region = 44  ;;  %s341_s11 = sand.u32 (%p3747_p4), 1, %s3639_s29  }
  0x2c   : > { %s2898_s12 = sshll.u32 (%p3747_p4), %s3647_s9, 1  ;;  %s3426_s14 = smul.u32 (%p3747_p4), 10, %s341_s11 }
  0x2d   : > { %s345_s23 = scalar_lea.vmem (%p3747_p4), %s4328_s5, %s2898_s12 }
  0x2e   : > { %v361_v0 = vld [vmem:[%s345_s23] sm:$0x3] (%p3747_p4)  ;;  %v363_v1 = vld [vmem:[%s345_s23 + $0x4] sm:$0x3] (%p3747_p4)  ;;  %v365_v2 = vld [vmem:[%s345_s23 + $0x8] sm:$0x3] (%p3747_p4) }
  0x2f   : > { %v367_v3 = vld [vmem:[%s345_s23 + $0xc] sm:$0x3] (%p3747_p4)  ;;  %v369_v4 = vld [vmem:[%s345_s23 + $0x10] sm:$0x3] (%p3747_p4)  ;;  %s343_s24 = scalar_lea.vmem (%p3747_p4), [#allocation3], %s3426_s14 }
  0x30   : > { %362 = vst [vmem:[%s343_s24] sm:$0x3] (%p3747_p4), %v361_v0  ;;  %364 = vst [vmem:[%s343_s24 + $0x2] sm:$0x3] (%p3747_p4), %v363_v1 }
  0x31   : > { %366 = vst [vmem:[%s343_s24 + $0x4] sm:$0x3] (%p3747_p4), %v365_v2  ;;  %368 = vst [vmem:[%s343_s24 + $0x6] sm:$0x3] (%p3747_p4), %v367_v3 }
  0x32   : > { %370 = vst [vmem:[%s343_s24 + $0x8] sm:$0x3] %v369_v4 }
  0x33 PF: > { %406 = sbr.rel (%p3768_p12) target bundleno = 3481 (0xd99), region = 85  ;;  %s3796_s15 = sand.u32 (!%p3768_p12), 1, %s3635_s28  }
  0x34   : > { %s3427_s25 = smul.u32 (!%p3768_p12), 10, %s3796_s15 }
  0x36   : > { %s3799_s26 = scalar_lea.vmem (!%p3768_p12), [#allocation3], %s3427_s25 }
  0x3a   : > { %3618 = dma.done.wait (%p3772_p13), [#allocation6], 128  }
  0x3b   : > { %3620 = vsyncadd (%p3772_p13), [#allocation6], 4294967168 }
  0x3c   : > { %419 = sfence }
  0x3d   : > { %v2908_v5 = vld [vmem:[%s4324_s1 + $0x80] sm:$0xff]  ;;  %v2909_v6 = vld [vmem:[%s4324_s1 + $0x88] sm:$0xff]  ;;  %v3654_v8 = vmov 0.0|0.0   ;;  %v2910_v11 = vld [vmem:[%s4324_s1 + $0x90] sm:$0xff]  ;;  %p474_p4 = scmp.lt.s32.totalorder %s3643_s30, 1  ;;  %vm3655_vm0 = vmmov 0   ;;  %v787_v23 = vlaneseq }
  0x3e   : > { %v535_v7 = vld [vmem:[%s4324_s1] sm:$0xff]  ;;  %3359 = vmatprep.subr.bf16.mxu1 %v3654_v8  ;;  %3353 = vmatprep.subr.bf16.mxu0 %v3654_v8  ;;  %v3360_v9 = vpack.c.bf16 %v2909_v6, %v2908_v5  ;;  %v536_v10 = vld [vmem:[%s4324_s1 + $0x8] sm:$0xff]  ;;  %v2911_v12 = vld [vmem:[%s4324_s1 + $0x98] sm:$0xff]  ;;  %v3656_v16 = vmov 0.0   ;;  %vm560_vm1 = vcmask 261120   ;;  %vm507_vm2 = vcmask 64512  }
  0x3f   : > { %v3354_v13 = vpack.c.bf16 %v536_v10, %v535_v7  ;;  %v537_v14 = vld [vmem:[%s4324_s1 + $0x10] sm:$0xff]  ;;  %v538_v15 = vld [vmem:[%s4324_s1 + $0x18] sm:$0xff]  ;;  %3176 = vmatprep.mubr.msk.f32.mxu1 %vm3655_vm0, %v3656_v16  ;;  %3165 = vmatprep.mubr.msk.f32.mxu0 %vm3655_vm0, %v3656_v16  ;;  %v3363_v17 = vpack.c.bf16 %v2911_v12, %v2910_v11  ;;  %s3837_s21 = scalar_select %p474_p4, %s3643_s30, 1  ;;  %v788_v24 = vshrl.u32 %v787_v23, 7  ;;  %v786_v27 = vld [vmem:[%s4327_s4] sm:$0x1f] }
  0x40   : > { %3361 = vmatpush3.bf16.msra.mxu1 %v3360_v9  ;;  %v3357_v18 = vpack.c.bf16 %v538_v15, %v537_v14  ;;  %v3054_v20 = vld [vmem:[%s3799_s26] sm:$0xff]   ;;  %v2920_v28 = vld [vmem:[%s4325_s2 + $0x4] ss:$0 sm:$0xff]  ;;  %v2918_v29 = vld [vmem:[%s4325_s2] ss:$0 sm:$0xff]  ;;  %s937_s22 = sld [smem:[#allocation4]] }
  0x41   : > { %3355 = vmatpush3.bf16.msra.mxu0 %v3354_v13  ;;  %3362 = vmatprep.subr.bf16.mxu1 %v3654_v8  ;;  %s2903_s23 = sshll.u32 %s3837_s21, 3  ;;  %v3055_v21 = vunpack.c.0.s8 %v3054_v20  ;;  %v3856_v25 = vsub.s32 0, %v788_v24  ;;  %v3858_v26 = vsub.s32 1, %v788_v24  ;;  %v3871_v36 = vsub.s32 2, %v788_v24  ;;  %v2907_v53 = vld [vmem:[%s3799_s26 + $0x8] sm:$0x3]  ;;  %s492_s12 = scalar_lea.vmem %s4326_s3, %s3837_s21 }
  0x42   : > { %3356 = vmatprep.subr.bf16.mxu0 %v3654_v8  ;;  %s477_s11 = scalar_lea.vmem %s4323_s0, %s2903_s23  ;;  %v3873_v39 = vsub.s32 3, %v788_v24  ;;  %v3879_v43 = vsub.s32 4, %v788_v24  ;;  %v3059_v49 = vunpack.c.2.s8 %v3054_v20  ;;  %v3056_v50 = vunpack.c.1.s8 %v3054_v20  ;;  %v2912_v58 = vld [vmem:[%s4324_s1 + $0x100] sm:$0xff]  ;;  %v2913_v59 = vld [vmem:[%s4324_s1 + $0x108] sm:$0xff]  ;;  %v2914_v60 = vld [vmem:[%s4324_s1 + $0x110] sm:$0xff]  ;;  %s2933_s23 = sld [smem:[#allocation4 + $0x100]] }
  0x43   : > { %v3845_v19 = vld [vmem:[%s477_s11] sm:$0xff]  ;;  %v506_v22 = vcvt.s32.f32 %v3055_v21  ;;  %v790_v31 = vrot.slane %v786_v27, %v3856_v25  ;;  %v795_v32 = vrot.slane %v786_v27, %v3858_v26  ;;  %v800_v42 = vrot.slane %v786_v27, %v3871_v36  ;;  %v2915_v62 = vld [vmem:[%s4324_s1 + $0x118] sm:$0xff]  ;;  %s2932_s24 = sld [smem:[#allocation4 + $0x80]]  ;;  %s2966_s17 = sld [smem:[#allocation4 + $0x1]] }
  0x44   : > { %3364 = vmatpush3.bf16.msra.mxu1 %v3363_v17  ;;  %v805_v44 = vrot.slane %v786_v27, %v3873_v39  ;;  %v810_v46 = vrot.slane %v786_v27, %v3879_v43  ;;  %v518_v51 = vcvt.s32.f32 %v3059_v49  ;;  %v512_v52 = vcvt.s32.f32 %v3056_v50  ;;  %v3918_v1 = vld [vmem:[%s492_s12] ss:$0 sm:$0xff]  ;;  %s2935_s26 = sld [smem:[#allocation4 + $0x200]]  ;;  %s2969_s25 = sld [smem:[#allocation4 + $0x181]] }
  0x45   : > { %3358 = vmatpush3.bf16.msra.mxu0 %v3357_v18  ;;  %508 = vst.msk [vmem:[#allocation2] sm:$0xff] %vm507_vm2, %v506_v22  ;;  %v529_v54 = vunpack.c.0.s8 %v2907_v53  ;;  %v3060_v55 = vunpack.c.3.s8 %v3054_v20  ;;  %v3366_v61 = vpack.c.bf16 %v2913_v59, %v2912_v58  ;;  %v3369_v63 = vpack.c.bf16 %v2915_v62, %v2914_v60  ;;  %s2934_s20 = sld [smem:[#allocation4 + $0x180]]  ;;  %v2941_v58 = vld [vmem:[%s4324_s1 + $0xa0] sm:$0xff]  ;;  %v2942_v59 = vld [vmem:[%s4324_s1 + $0xa8] sm:$0xff]  ;;  %s3002_s21 = sld [smem:[#allocation4 + $0x2]] }
  0x46   : > { %3365 = vmatprep.subr.bf16.mxu0 %v3654_v8  ;;  %520 = vst.msk [vmem:[#allocation2 + $0x10] sm:$0xff] %vm507_vm2, %v518_v51  ;;  %514 = vst.msk [vmem:[#allocation2 + $0x8] sm:$0xff] %vm507_vm2, %v512_v52  ;;  %v938_v0 = vstv %s937_s22  ;;  %v2937_v51 = vld [vmem:[%s4324_s1 + $0x20] sm:$0xff]  ;;  %v2938_v52 = vld [vmem:[%s4324_s1 + $0x28] sm:$0xff]  ;;  %s2968_s22 = sld [smem:[#allocation4 + $0x101]]  ;;  %s3003_s14 = sld [smem:[#allocation4 + $0x82]] }
  0x47   : > { %3177 = vmatmul.mubr.msk.f32.vlgmr.msra.gmra.mrb[0].mxu1 %vm560_vm1, %v3845_v19  ;;  %v530_v56 = vcvt.s32.f32 %v529_v54  ;;  %v524_v57 = vcvt.s32.f32 %v3060_v55  ;;  %v3372_v53 = vpack.c.bf16 %v2938_v52, %v2937_v51  ;;  %v2939_v54 = vld [vmem:[%s4324_s1 + $0x30] sm:$0xff]  ;;  %v2940_v55 = vld [vmem:[%s4324_s1 + $0x38] sm:$0xff]  ;;  %s3040_s11 = sld [smem:[#allocation4 + $0x103]]  ;;  %p4338_p12 = scmp.ne.s32.totalorder %s4334_s16, 0 }
  0x48   : > { %3166 = vmatmul.mubr.msk.f32.vlgmr.msra.gmra.mrb[0].mxu0 %vm560_vm1, %v3845_v19  ;;  %v961_v9 = vstv %s2933_s23  ;;  %s2967_s23 = sld [smem:[#allocation4 + $0x81]] }
  0x49   : > { %3187 = vmatprep.mubr.msk.f32.mxu0 %vm3655_vm0, %v3656_v16  ;;  %532 = vst.msk [vmem:[#allocation2 + $0x20] sm:$0xff] %vm507_vm2, %v530_v56  ;;  %526 = vst.msk [vmem:[#allocation2 + $0x18] sm:$0xff] %vm507_vm2, %v524_v57  ;;  %3367 = vmatpush3.bf16.msra.mxu0 %v3366_v61  ;;  %v951_v10 = vstv %s2932_s24  ;;  %v3375_v56 = vpack.c.bf16 %v2940_v55, %v2939_v54  ;;  %v3378_v61 = vpack.c.bf16 %v2942_v59, %v2941_v58  ;;  %s2970_s24 = sld [smem:[#allocation4 + $0x201]] }
  0x4a   : > { %3368 = vmatprep.subr.bf16.mxu0 %v3654_v8  ;;  %v981_v20 = vstv %s2935_s26  ;;  %s3039_s26 = sld [smem:[#allocation4 + $0x83]] }
  0x4b   : > { %v971_v21 = vstv %s2934_s20  ;;  %s2902_s20 = sshll.u32 %s3796_s15, 5 }
  0x4c   : > { %v3920_v3 = vld [vmem:[#allocation2] sm:$0xff]  ;;  %s3973_s12 = scalar_lea.vmem [#allocation8], %s2902_s20  ;;  %s3004_s20 = sld [smem:[#allocation4 + $0x102]] }
  0x4d   : > { %3370 = vmatpush3.bf16.msra.mxu0 %v3369_v63  ;;  %v3924_v14 = vld [vmem:[#allocation2 + $0x8] sm:$0xff]  ;;  %v3926_v18 = vld [vmem:[#allocation2 + $0x10] sm:$0xff] }
  0x4e   : > { %3201 = vmatprep.subr.mxu0 %v3656_v16  ;;  %v2943_v63 = vld [vmem:[%s4324_s1 + $0xb0] sm:$0xff] }
  0x50   : > { %3188 = vmatmul.mubr.msk.f32.vlgmr.msra.gmra.mrb[2].mxu0 %vm560_vm1, %v3845_v19  ;;  %v3929_v27 = vld [vmem:[#allocation2 + $0x18] sm:$0xff] }
  0x51   : > { %3203 = vmatprep.mubr.msk.f32.mxu0 %vm3655_vm0, %v3656_v16 }
 0x11a   : > { %v706_v30 = vpop.f32.mrb[0].mxu1 }
 0x11b   : > { %v707_v33 = vadd.f32 %v2920_v28, %v706_v30  ;;  %v630_v34 = vpop.f32.mrb[0].mxu0  ;;  %v3178_v35 = vpop.f32.mrb[1].mxu1 }
 0x11c   : > { %v631_v37 = vadd.f32 %v2918_v29, %v630_v34  ;;  %v3167_v38 = vpop.f32.mrb[1].mxu0 }
 0x11d   : > { %3190 = vmatprep.subr.msk.mxu1 %vm507_vm2, %v707_v33 }
 0x11e   : > { %3191 = vmatpush3.xpose.msk.msra.mxu1 %vm507_vm2, %v707_v33  ;;  %3192 = vmatprep.mubr.msk.f32.mxu1 %vm507_vm2, %v631_v37  ;;  %v791_v40 = vmul.f32 %v790_v31, %v631_v37  ;;  %v796_v41 = vmul.f32 %v795_v32, %v631_v37  ;;  %v801_v45 = vmul.f32 %v800_v42, %v631_v37  ;;  %v3932_v32 = vld [vmem:[#allocation2 + $0x20] sm:$0xff] }
 0x11f   : > { %3371 = vmatprep.subr.bf16.mxu1 %v3654_v8  ;;  %v806_v47 = vmul.f32 %v805_v44, %v631_v37  ;;  %v811_v48 = vmul.f32 %v810_v46, %v631_v37 }
 0x121   : > { %3193 = vmatmul.mubr.msk.f32.vlgmr.msra.gmra.mrb[2].mxu1 %vm507_vm2, %v791_v40 }
 0x122   : > { %3195 = vmatprep.mubr.msk.f32.mxu1 %vm507_vm2, %v796_v41  ;;  %3373 = vmatpush3.bf16.msra.mxu1 %v3372_v53 }
 0x123   : > { %3374 = vmatprep.subr.bf16.mxu1 %v3654_v8 }
 0x125   : > { %3196 = vmatmul.mubr.msk.f32.gmra.mrb[4].mxu1 %vm507_vm2, %v801_v45 }
 0x126   : > { %3198 = vmatprep.mubr.msk.f32.mxu1 %vm507_vm2, %v806_v47  ;;  %v782_v47 = vpop.f32.mrb[2].mxu0  ;;  %3376 = vmatpush3.bf16.msra.mxu1 %v3375_v56  ;;  %v1507_v56 = vstv %s2970_s24  ;;  %s3052_s24 = sshll.u32 %s3643_s30, 9 }
 0x127   : > { %v3189_v49 = vpop.f32.mrb[3].mxu0  ;;  %3383 = vmatprep.subr.bf16.mxu1 %v3654_v8 }
 0x128   : > { %v1489_v49 = vstv %s2968_s22  ;;  %s3005_s22 = sld [smem:[#allocation4 + $0x182]] }
 0x129   : > { %3199 = vmatmul.mubr.msk.f32.gmra.mrb[6].mxu1 %vm507_vm2, %v811_v48  ;;  %v2922_v48 = vld [vmem:[%s4325_s2 + $0x8] ss:$0 sm:$0xff] }
 0x12a   : > { %3214 = vmatprep.mubr.msk.f32.mxu1 %vm3655_vm0, %v3656_v16  ;;  %v783_v50 = vadd.f32 %v2922_v48, %v782_v47 }
 0x12c   : > { %3202 = vmatpush3.msra.mxu0 %v783_v50  ;;  %v1480_v50 = vstv %s2967_s23 }
 0x12d   : > { %3377 = vmatprep.subr.bf16.mxu0 %v3654_v8  ;;  %3215 = vmatmul.mubr.msk.f32.vlgmr.msra.gmra.mrb[8].mxu1 %vm560_vm1, %v3845_v19 }
 0x12e   : > { %3236 = vmatprep.mubr.msk.f32.mxu1 %vm3655_vm0, %v3656_v16 }
 0x1f4   : > { %v3194_v2 = vpop.f32.mrb[2].mxu1 }
 0x1f5   : > { %v939_v4 = vadd.f32 %v3194_v2, %v938_v0  ;;  %v900_v5 = vpop.f32.mrb[3].mxu1  ;;  %v2944_v0 = vld [vmem:[%s4324_s1 + $0xb8] sm:$0xff] }
 0x1f6   : > { %v935_v6 = vadd.f32 %v3918_v1, %v900_v5  ;;  %v3381_v2 = vpack.c.bf16 %v2944_v0, %v2943_v63 }
 0x1f7   : > { %v941_v7 = vmul.f32 %v3920_v3, %v939_v4  ;;  %v2952_v4 = vld [vmem:[%s4325_s2 + $0x1] ss:$0 sm:$0xff] }
 0x1f8   : > { %v3197_v11 = vpop.f32.mrb[4].mxu1 }
 0x1f9   : > { %v942_v12 = vadd.f32 %v941_v7, %v935_v6  ;;  %v910_v13 = vpop.f32.mrb[5].mxu1  ;;  %v962_v15 = vadd.f32 %v3197_v11, %v961_v9  ;;  %v2958_v11 = vld [vmem:[%s4327_s4 + $0x8] sm:$0x1f] }
 0x1fa   : > { %v952_v17 = vadd.f32 %v951_v10, %v910_v13  ;;  %v1326_v13 = vrot.slane %v2958_v11, %v3856_v25 }
 0x1fb   : > { %v965_v28 = vmul.f32 %v3926_v18, %v962_v15 }
 0x1fc   : > { %v955_v22 = vmul.f32 %v3924_v14, %v952_v17  ;;  %v3200_v23 = vpop.f32.mrb[6].mxu1  ;;  %v1331_v17 = vrot.slane %v2958_v11, %v3858_v26 }
 0x1fd   : > { %v920_v24 = vpop.f32.mrb[7].mxu1  ;;  %v982_v30 = vadd.f32 %v3200_v23, %v981_v20 }
 0x1fe   : > { %v956_v29 = vadd.f32 %v955_v22, %v942_v12  ;;  %v972_v31 = vadd.f32 %v971_v21, %v920_v24  ;;  %v2954_v12 = vld [vmem:[%s4325_s2 + $0x5] ss:$0 sm:$0xff]  ;;  %v1336_v24 = vrot.slane %v2958_v11, %v3871_v36 }
 0x1ff   : > { %v985_v35 = vmul.f32 %v3932_v32, %v982_v30  ;;  %v1346_v30 = vrot.slane %v2958_v11, %v3879_v43 }
 0x200   : > { %v975_v33 = vmul.f32 %v3929_v27, %v972_v31  ;;  %v966_v34 = vadd.f32 %v965_v28, %v956_v29  ;;  %v1165_v5 = vpop.f32.mrb[8].mxu1  ;;  %v1341_v28 = vrot.slane %v2958_v11, %v3873_v39 }
 0x201   : > { %v1166_v6 = vadd.f32 %v2952_v4, %v1165_v5  ;;  %v3216_v7 = vpop.f32.mrb[9].mxu1 }
 0x202   : > { %v976_v37 = vadd.f32 %v975_v33, %v966_v34  ;;  %v2945_v34 = vld [vmem:[%s4324_s1 + $0x120] sm:$0xff] }
 0x203   : > { %v1327_v22 = vmul.f32 %v1326_v13, %v1166_v6  ;;  %v1332_v23 = vmul.f32 %v1331_v17, %v1166_v6  ;;  %v1337_v29 = vmul.f32 %v1336_v24, %v1166_v6  ;;  %v1342_v31 = vmul.f32 %v1341_v28, %v1166_v6  ;;  %v2973_v24 = vld [vmem:[%s4324_s1 + $0x40] sm:$0xff]  ;;  %v2974_v28 = vld [vmem:[%s4324_s1 + $0x48] sm:$0xff] }
 0x204   : > { %v986_v38 = vadd.f32 %v985_v35, %v976_v37  ;;  %v1347_v33 = vmul.f32 %v1346_v30, %v1166_v6  ;;  %v2946_v35 = vld [vmem:[%s4324_s1 + $0x128] sm:$0xff]  ;;  %v2947_v37 = vld [vmem:[%s4324_s1 + $0x130] sm:$0xff] }
 0x205   : > { %v2975_v30 = vld [vmem:[%s4324_s1 + $0x50] sm:$0xff] }
 0x206   : > { %v987_v40 = vsel %vm507_vm2, %v986_v38, -inf }
 0x207   : > { %988 = vmax.xlane.f32.xlu0 %v987_v40  ;;  %v2948_v40 = vld [vmem:[%s4324_s1 + $0x138] sm:$0xff] }
 0x294   : > { %v989_v41 = vpop.xlane.xlu0 %988 }
 0x295   : > { %v990_v42 = vsub.f32 %v986_v38, %v989_v41  ;;  %v3384_v38 = vpack.c.bf16 %v2946_v35, %v2945_v34  ;;  %v3387_v41 = vpack.c.bf16 %v2948_v40, %v2947_v37  ;;  %v2977_v35 = vld [vmem:[%s4324_s1 + $0xc0] sm:$0xff]  ;;  %v2978_v37 = vld [vmem:[%s4324_s1 + $0xc8] sm:$0xff] }
 0x296   : > { %v3396_v40 = vpack.c.bf16 %v2978_v37, %v2977_v35  ;;  %v2024_v35 = vstv %s3005_s22  ;;  %s3659_s22 = smov [#allocation8]  }
 0x297   : > { %v991_v44 = vmul.f32 1.442695, %v990_v42  ;;  %3385 = vmatpush3.bf16.msra.mxu1 %v3384_v38  ;;  %v1467_v42 = vstv %s2966_s17  ;;  %s3006_s17 = sld [smem:[#allocation4 + $0x202]]  ;;  %s3541_s23 = sshll.u32 %s3659_s22, 4  ;;  %s3542_s23 = int_to_ptr.vmem [resolvable:$false] %s3541_s23 }
 0x298   : > { %3386 = vmatprep.subr.bf16.mxu1 %v3654_v8 }
 0x299   : > { %3506 = vpow2.f32 %v991_v44 }
 0x29b   : > { %3388 = vmatpush3.bf16.msra.mxu1 %v3387_v41 }
 0x29c   : > { %3250 = vmatprep.subr.mxu1 %v3656_v16 }
 0x29e   : > { %3237 = vmatmul.mubr.msk.f32.vlgmr.msra.gmra.mrb[10].mxu1 %vm560_vm1, %v3845_v19 }
 0x29f   : > { %3252 = vmatprep.mubr.msk.f32.mxu1 %vm3655_vm0, %v3656_v16 }
 0x2a3   : > { %v3507_v45 = vpop.eup %3506 }
 0x2a4   : > { %v993_v46 = vsel %vm507_vm2, %v3507_v45, 0.0 }
 0x2a5   : > { %994 = vadd.xlane.f32.xlu0 %v993_v46 }
 0x332   : > { %v995_v57 = vpop.xlane.xlu0 %994 }
 0x333   : > { %3508 = vrcp.f32 %v995_v57  ;;  %v1498_v57 = vstv %s2969_s25  ;;  %s3038_s25 = sld [smem:[#allocation4 + $0x3]] }
 0x33d   : > { %v3509_v60 = vpop.eup %3508 }
 0x33e   : > { %v997_v62 = vmul.f32 %v3509_v60, %v3507_v45 }
 0x340   : > { %998 = vst.msk [vmem:[%s3973_s12] sm:$0xff] %vm507_vm2, %v997_v62  ;;  %3204 = vmatmul.mubr.msk.f32.vlgmr.msra.gmra.mrb[4].mxu0 %vm507_vm2, %v997_v62 }
 0x341   : > { %3379 = vmatpush3.bf16.msra.mxu0 %v3378_v61  ;;  %3225 = vmatprep.mubr.msk.f32.mxu0 %vm3655_vm0, %v3656_v16 }
 0x342   : > { %3380 = vmatprep.subr.bf16.mxu0 %v3654_v8 }
 0x345   : > { %3382 = vmatpush3.bf16.msra.mxu0 %v3381_v2 }
 0x348   : > { %3226 = vmatmul.mubr.msk.f32.vlgmr.msra.gmra.mrb[6].mxu0 %vm560_vm1, %v3845_v19 }
 0x349   : > { %3241 = vmatprep.mubr.msk.f32.mxu0 %vm507_vm2, %v1166_v6 }
 0x413   : > { %v3987_v9 = vpop.f32.mrb[4].mxu0 }
 0x414   : > { %v3205_v10 = vpop.f32.mrb[5].mxu0 }
 0x41b   : > { %v1241_v15 = vpop.f32.mrb[6].mxu0 }
 0x41c   : > { %v1242_v20 = vadd.f32 %v2954_v12, %v1241_v15  ;;  %v3227_v21 = vpop.f32.mrb[7].mxu0 }
 0x41d   : > { %v2956_v21 = vld [vmem:[%s4325_s2 + $0x9] ss:$0 sm:$0xff] }
 0x41e   : > { %3239 = vmatprep.subr.msk.mxu0 %vm507_vm2, %v1242_v20 }
 0x41f   : > { %3240 = vmatpush3.xpose.msk.msra.mxu0 %vm507_vm2, %v1242_v20  ;;  %v1317_v20 = vpop.f32.mrb[10].mxu1 }
 0x420   : > { %3389 = vmatprep.subr.bf16.mxu0 %v3654_v8 }
 0x422   : > { %3242 = vmatmul.mubr.msk.f32.vlgmr.msra.gmra.mrb[8].mxu0 %vm507_vm2, %v1327_v22  ;;  %v3238_v22 = vpop.f32.mrb[11].mxu1 }
 0x423   : > { %3244 = vmatprep.mubr.msk.f32.mxu0 %vm507_vm2, %v1332_v23  ;;  %v1318_v23 = vadd.f32 %v2956_v21, %v1317_v20 }
 0x425   : > { %3251 = vmatpush3.msra.mxu1 %v1318_v23  ;;  %v2015_v23 = vstv %s3004_s20  ;;  %s3041_s20 = sld [smem:[#allocation4 + $0x183]] }
 0x426   : > { %3245 = vmatmul.mubr.msk.f32.gmra.mrb[10].mxu0 %vm507_vm2, %v1337_v29  ;;  %v3390_v29 = vpack.c.bf16 %v2974_v28, %v2973_v24  ;;  %3395 = vmatprep.subr.bf16.mxu1 %v3654_v8  ;;  %v2006_v24 = vstv %s3003_s14  ;;  %s3657_s14 = smov 8  }
 0x427   : > { %3247 = vmatprep.mubr.msk.f32.mxu0 %vm507_vm2, %v1342_v31  ;;  %v2976_v31 = vld [vmem:[%s4324_s1 + $0x58] sm:$0xff] }
 0x428   : > { %3391 = vmatpush3.bf16.msra.mxu0 %v3390_v29 }
 0x429   : > { %3392 = vmatprep.subr.bf16.mxu0 %v3654_v8 }
 0x42a   : > { %3248 = vmatmul.mubr.msk.f32.gmra.mrb[12].mxu0 %vm507_vm2, %v1347_v33  ;;  %v3393_v33 = vpack.c.bf16 %v2976_v31, %v2975_v30 }
 0x42b   : > { %3263 = vmatprep.mubr.msk.f32.mxu0 %vm3655_vm0, %v3656_v16 }
 0x42c   : > { %3394 = vmatpush3.bf16.msra.mxu0 %v3393_v33 }
 0x42d   : > { %3401 = vmatprep.subr.bf16.mxu0 %v3654_v8 }
 0x42f   : > { %3264 = vmatmul.mubr.msk.f32.vlgmr.msra.gmra.mrb[14].mxu0 %vm560_vm1, %v3845_v19 }
 0x430   : > { %3285 = vmatprep.mubr.msk.f32.mxu0 %vm3655_vm0, %v3656_v16 }
 0x4f5   : > { %v3243_v44 = vpop.f32.mrb[8].mxu0 }
 0x4f6   : > { %v1468_v45 = vadd.f32 %v3243_v44, %v1467_v42  ;;  %v1435_v46 = vpop.f32.mrb[9].mxu0  ;;  %v2979_v42 = vld [vmem:[%s4324_s1 + $0xd0] sm:$0xff]  ;;  %v2980_v44 = vld [vmem:[%s4324_s1 + $0xd8] sm:$0xff] }
 0x4f7   : > { %v1464_v47 = vadd.f32 %v3918_v1, %v1435_v46  ;;  %v2988_v46 = vld [vmem:[%s4325_s2 + $0x2] ss:$0 sm:$0xff] }
 0x4f8   : > { %v1470_v48 = vmul.f32 %v1468_v45, %v3920_v3  ;;  %v3399_v45 = vpack.c.bf16 %v2980_v44, %v2979_v42 }
 0x4f9   : > { %v3246_v51 = vpop.f32.mrb[10].mxu0 }
 0x4fa   : > { %v1471_v52 = vadd.f32 %v1470_v48, %v1464_v47  ;;  %v1445_v53 = vpop.f32.mrb[11].mxu0  ;;  %v1490_v54 = vadd.f32 %v3246_v51, %v1489_v49 }
 0x4fb   : > { %v1481_v55 = vadd.f32 %v1480_v50, %v1445_v53  ;;  %v2990_v53 = vld [vmem:[%s4325_s2 + $0x6] ss:$0 sm:$0xff] }
 0x4fc   : > { %v1492_v61 = vmul.f32 %v1490_v54, %v3926_v18 }
 0x4fd   : > { %v1483_v58 = vmul.f32 %v1481_v55, %v3924_v14  ;;  %v3249_v59 = vpop.f32.mrb[12].mxu0 }
 0x4fe   : > { %v1455_v60 = vpop.f32.mrb[13].mxu0  ;;  %v1508_v63 = vadd.f32 %v3249_v59, %v1507_v56 }
 0x4ff   : > { %v1484_v62 = vadd.f32 %v1483_v58, %v1471_v52  ;;  %v1499_v0 = vadd.f32 %v1498_v57, %v1455_v60  ;;  %v2994_v52 = vld [vmem:[%s4327_s4 + $0x10] sm:$0x1f] }
 0x500   : > { %v1510_v5 = vmul.f32 %v1508_v63, %v3932_v32  ;;  %v1852_v54 = vrot.slane %v2994_v52, %v3856_v25  ;;  %v1857_v56 = vrot.slane %v2994_v52, %v3858_v26 }
 0x501   : > { %v1501_v2 = vmul.f32 %v1499_v0, %v3929_v27  ;;  %v1493_v4 = vadd.f32 %v1492_v61, %v1484_v62  ;;  %v1862_v61 = vrot.slane %v2994_v52, %v3871_v36  ;;  %v1867_v62 = vrot.slane %v2994_v52, %v3873_v39 }
 0x502   : > { %v1691_v47 = vpop.f32.mrb[14].mxu0  ;;  %v1872_v0 = vrot.slane %v2994_v52, %v3879_v43 }
 0x503   : > { %v1502_v6 = vadd.f32 %v1501_v2, %v1493_v4  ;;  %v1692_v48 = vadd.f32 %v2988_v46, %v1691_v47  ;;  %v3265_v49 = vpop.f32.mrb[15].mxu0 }
 0x505   : > { %v1511_v7 = vadd.f32 %v1510_v5, %v1502_v6  ;;  %v1853_v59 = vmul.f32 %v1852_v54, %v1692_v48  ;;  %v1858_v60 = vmul.f32 %v1857_v56, %v1692_v48  ;;  %v1863_v63 = vmul.f32 %v1862_v61, %v1692_v48  ;;  %v2981_v5 = vld [vmem:[%s4324_s1 + $0x140] sm:$0xff]  ;;  %v2982_v6 = vld [vmem:[%s4324_s1 + $0x148] sm:$0xff] }
 0x506   : > { %v1868_v2 = vmul.f32 %v1867_v62, %v1692_v48  ;;  %v1873_v4 = vmul.f32 %v1872_v0, %v1692_v48  ;;  %v3009_v62 = vld [vmem:[%s4324_s1 + $0x60] sm:$0xff] }
 0x507   : > { %v1512_v10 = vsel %vm507_vm2, %v1511_v7, -inf }
 0x508   : > { %1513 = vmax.xlane.f32.xlu1 %v1512_v10  ;;  %v3402_v10 = vpack.c.bf16 %v2982_v6, %v2981_v5 }
 0x50a   : > { %3403 = vmatpush3.bf16.msra.mxu0 %v3402_v10  ;;  %v3014_v10 = vld [vmem:[%s4324_s1 + $0xe8] sm:$0xff] }
 0x50b   : > { %3404 = vmatprep.subr.bf16.mxu0 %v3654_v8 }
 0x595   : > { %v1514_v11 = vpop.xlane.xlu1 %1513 }
 0x596   : > { %v1515_v12 = vsub.f32 %v1511_v7, %v1514_v11  ;;  %v2983_v7 = vld [vmem:[%s4324_s1 + $0x150] sm:$0xff]  ;;  %v2984_v11 = vld [vmem:[%s4324_s1 + $0x158] sm:$0xff] }
 0x598   : > { %v1516_v13 = vmul.f32 1.442695, %v1515_v12  ;;  %v3405_v12 = vpack.c.bf16 %v2984_v11, %v2983_v7  ;;  %v3013_v7 = vld [vmem:[%s4324_s1 + $0xe0] sm:$0xff] }
 0x59a   : > { %3510 = vpow2.f32 %v1516_v13  ;;  %3406 = vmatpush3.bf16.msra.mxu0 %v3405_v12  ;;  %v1993_v13 = vstv %s3002_s21  ;;  %v3414_v12 = vpack.c.bf16 %v3014_v10, %v3013_v7  ;;  %s3042_s21 = sld [smem:[#allocation4 + $0x203]] }
 0x59b   : > { %3299 = vmatprep.subr.mxu0 %v3656_v16 }
 0x59d   : > { %3286 = vmatmul.mubr.msk.f32.vlgmr.msra.gmra.mrb[16].mxu0 %vm560_vm1, %v3845_v19 }
 0x59e   : > { %3301 = vmatprep.mubr.msk.f32.mxu0 %vm3655_vm0, %v3656_v16 }
 0x5a4   : > { %v3511_v15 = vpop.eup %3510 }
 0x5a5   : > { %v1518_v17 = vsel %vm507_vm2, %v3511_v15, 0.0 }
 0x5a6   : > { %1519 = vadd.xlane.f32.xlu1 %v1518_v17 }
 0x633   : > { %v1520_v34 = vpop.xlane.xlu1 %1519 }
 0x634   : > { %3512 = vrcp.f32 %v1520_v34  ;;  %v2033_v34 = vstv %s3006_s17  ;;  %s3658_s17 = smov 16  }
 0x63e   : > { %v3513_v38 = vpop.eup %3512 }
 0x63f   : > { %v1522_v41 = vmul.f32 %v3513_v38, %v3511_v15 }
 0x641   : > { %2971 = vst.msk [vmem:[%s3973_s12 + $0x8] sm:$0xff] %vm507_vm2, %v1522_v41  ;;  %3253 = vmatmul.mubr.msk.f32.vlgmr.msra.gmra.mrb[12].mxu1 %vm507_vm2, %v1522_v41 }
 0x642   : > { %3397 = vmatpush3.bf16.msra.mxu1 %v3396_v40  ;;  %3274 = vmatprep.mubr.msk.f32.mxu1 %vm3655_vm0, %v3656_v16 }
 0x643   : > { %3398 = vmatprep.subr.bf16.mxu1 %v3654_v8 }
 0x646   : > { %3400 = vmatpush3.bf16.msra.mxu1 %v3399_v45 }
 0x649   : > { %3275 = vmatmul.mubr.msk.f32.vlgmr.msra.gmra.mrb[14].mxu1 %vm560_vm1, %v3845_v19 }
 0x64a   : > { %3290 = vmatprep.mubr.msk.f32.mxu1 %vm507_vm2, %v1692_v48 }
 0x714   : > { %v4082_v50 = vpop.f32.mrb[12].mxu1 }
 0x715   : > { %v3254_v51 = vpop.f32.mrb[13].mxu1 }
 0x71c   : > { %v1767_v55 = vpop.f32.mrb[14].mxu1 }
 0x71d   : > { %v1768_v57 = vadd.f32 %v2990_v53, %v1767_v55  ;;  %v3276_v58 = vpop.f32.mrb[15].mxu1 }
 0x71e   : > { %v1843_v58 = vpop.f32.mrb[16].mxu0 }
 0x71f   : > { %3288 = vmatprep.subr.msk.mxu1 %vm507_vm2, %v1768_v57 }
 0x720   : > { %3289 = vmatpush3.xpose.msk.msra.mxu1 %vm507_vm2, %v1768_v57 }
 0x721   : > { %3407 = vmatprep.subr.bf16.mxu1 %v3654_v8 }
 0x723   : > { %3291 = vmatmul.mubr.msk.f32.vlgmr.msra.gmra.mrb[16].mxu1 %vm507_vm2, %v1853_v59  ;;  %v2992_v59 = vld [vmem:[%s4325_s2 + $0xa] ss:$0 sm:$0xff] }
 0x724   : > { %3293 = vmatprep.mubr.msk.f32.mxu1 %vm507_vm2, %v1858_v60  ;;  %v3287_v60 = vpop.f32.mrb[17].mxu0  ;;  %v1844_v61 = vadd.f32 %v2992_v59, %v1843_v58 }
 0x726   : > { %3300 = vmatpush3.msra.mxu0 %v1844_v61  ;;  %v2559_v61 = vstv %s3042_s21  ;;  %s4237_s21 = scalar_lea.hbm %s4331_s8, %s3052_s24 }
 0x727   : > { %3294 = vmatmul.mubr.msk.f32.gmra.mrb[18].mxu1 %vm507_vm2, %v1863_v63  ;;  %v3010_v63 = vld [vmem:[%s4324_s1 + $0x68] sm:$0xff]  ;;  %3413 = vmatprep.subr.bf16.mxu0 %v3654_v8 }
 0x728   : > { %3296 = vmatprep.mubr.msk.f32.mxu1 %vm507_vm2, %v1868_v2  ;;  %v3408_v0 = vpack.c.bf16 %v3010_v63, %v3009_v62  ;;  %v3011_v2 = vld [vmem:[%s4324_s1 + $0x70] sm:$0xff]  ;;  %v2550_v62 = vstv %s3041_s20 }
 0x72a   : > { %3409 = vmatpush3.bf16.msra.mxu1 %v3408_v0 }
 0x72b   : > { %3297 = vmatmul.mubr.msk.f32.gmra.mrb[20].mxu1 %vm507_vm2, %v1873_v4  ;;  %3410 = vmatprep.subr.bf16.mxu1 %v3654_v8  ;;  %v3012_v4 = vld [vmem:[%s4324_s1 + $0x78] sm:$0xff] }
 0x72c   : > { %3312 = vmatprep.mubr.msk.f32.mxu1 %vm3655_vm0, %v3656_v16  ;;  %v3411_v5 = vpack.c.bf16 %v3012_v4, %v3011_v2 }
 0x72e   : > { %3412 = vmatpush3.bf16.msra.mxu1 %v3411_v5 }
 0x72f   : > { %3419 = vmatprep.subr.bf16.mxu1 %v3654_v8 }
 0x731   : > { %3313 = vmatmul.mubr.msk.f32.vlgmr.msra.gmra.mrb[22].mxu1 %vm560_vm1, %v3845_v19 }
 0x732   : > { %3334 = vmatprep.mubr.msk.f32.mxu1 %vm3655_vm0, %v3656_v16 }
 0x7f6   : > { %v3292_v15 = vpop.f32.mrb[16].mxu1 }
 0x7f7   : > { %v1994_v17 = vadd.f32 %v3292_v15, %v1993_v13  ;;  %v1961_v20 = vpop.f32.mrb[17].mxu1  ;;  %v3015_v15 = vld [vmem:[%s4324_s1 + $0xf0] sm:$0xff] }
 0x7f8   : > { %v1990_v21 = vadd.f32 %v3918_v1, %v1961_v20 }
 0x7f9   : > { %v1996_v22 = vmul.f32 %v1994_v17, %v3920_v3  ;;  %v3016_v17 = vld [vmem:[%s4324_s1 + $0xf8] sm:$0xff] }
 0x7fa   : > { %v3295_v28 = vpop.f32.mrb[18].mxu1  ;;  %v3417_v20 = vpack.c.bf16 %v3016_v17, %v3015_v15 }
 0x7fb   : > { %v1997_v29 = vadd.f32 %v1996_v22, %v1990_v21  ;;  %v1971_v30 = vpop.f32.mrb[19].mxu1  ;;  %v2016_v31 = vadd.f32 %v3295_v28, %v2015_v23  ;;  %v3024_v21 = vld [vmem:[%s4325_s2 + $0x3] ss:$0 sm:$0xff] }
 0x7fc   : > { %v2007_v33 = vadd.f32 %v2006_v24, %v1971_v30  ;;  %v3030_v30 = vld [vmem:[%s4327_s4 + $0x18] sm:$0x1f] }
 0x7fd   : > { %v2018_v41 = vmul.f32 %v2016_v31, %v3926_v18  ;;  %v3026_v31 = vld [vmem:[%s4325_s2 + $0x7] ss:$0 sm:$0xff] }
 0x7fe   : > { %v2009_v37 = vmul.f32 %v2007_v33, %v3924_v14  ;;  %v3298_v38 = vpop.f32.mrb[20].mxu1  ;;  %v2378_v33 = vrot.slane %v3030_v30, %v3856_v25 }
 0x7ff   : > { %v1981_v40 = vpop.f32.mrb[21].mxu1  ;;  %v2034_v44 = vadd.f32 %v3298_v38, %v2033_v34 }
 0x800   : > { %v2010_v42 = vadd.f32 %v2009_v37, %v1997_v29  ;;  %v2025_v45 = vadd.f32 %v2024_v35, %v1981_v40  ;;  %v2383_v35 = vrot.slane %v3030_v30, %v3858_v26 }
 0x801   : > { %v2036_v48 = vmul.f32 %v2034_v44, %v3932_v32  ;;  %v2393_v44 = vrot.slane %v3030_v30, %v3873_v39  ;;  %v3018_v39 = vld [vmem:[%s4324_s1 + $0x168] sm:$0xff] }
 0x802   : > { %v2027_v46 = vmul.f32 %v2025_v45, %v3929_v27  ;;  %v2019_v47 = vadd.f32 %v2018_v41, %v2010_v42  ;;  %v2388_v42 = vrot.slane %v3030_v30, %v3871_v36  ;;  %v2398_v45 = vrot.slane %v3030_v30, %v3879_v43  ;;  %v3017_v36 = vld [vmem:[%s4324_s1 + $0x160] sm:$0xff]  ;;  %v3019_v43 = vld [vmem:[%s4324_s1 + $0x170] sm:$0xff] }
 0x804   : > { %v2028_v49 = vadd.f32 %v2027_v46, %v2019_v47  ;;  %v2217_v22 = vpop.f32.mrb[22].mxu1  ;;  %v3420_v47 = vpack.c.bf16 %v3018_v39, %v3017_v36 }
 0x805   : > { %v2218_v23 = vadd.f32 %v3024_v21, %v2217_v22  ;;  %v3314_v24 = vpop.f32.mrb[23].mxu1 }
 0x806   : > { %v2037_v51 = vadd.f32 %v2036_v48, %v2028_v49  ;;  %v3020_v48 = vld [vmem:[%s4324_s1 + $0x178] sm:$0xff]  ;;  %3421 = vmatpush3.bf16.msra.mxu1 %v3420_v47 }
 0x807   : > { %v2379_v40 = vmul.f32 %v2378_v33, %v2218_v23  ;;  %v2384_v41 = vmul.f32 %v2383_v35, %v2218_v23  ;;  %v2389_v25 = vmul.f32 %v2388_v42, %v2218_v23  ;;  %v2394_v26 = vmul.f32 %v2393_v44, %v2218_v23  ;;  %3422 = vmatprep.subr.bf16.mxu1 %v3654_v8 }
 0x808   : > { %v2038_v52 = vsel %vm507_vm2, %v2037_v51, -inf  ;;  %v2399_v46 = vmul.f32 %v2398_v45, %v2218_v23  ;;  %v3423_v49 = vpack.c.bf16 %v3020_v48, %v3019_v43 }
 0x809   : > { %2039 = vmax.xlane.f32.xlu0 %v2038_v52 }
 0x80a   : > { %3424 = vmatpush3.bf16.msra.mxu1 %v3423_v49 }
 0x80b   : > { %3348 = vmatprep.subr.mxu1 %v3656_v16 }
 0x80d   : > { %3335 = vmatmul.mubr.msk.f32.vlgmr.msra.gmra.mrb[24].mxu1 %vm560_vm1, %v3845_v19 }
 0x80e   : > { %3350 = vmatprep.mubr.msk.f32.mxu1 %vm3655_vm0, %v3656_v16 }
 0x896   : > { %v2040_v53 = vpop.xlane.xlu0 %2039 }
 0x897   : > { %v2041_v54 = vsub.f32 %v2037_v51, %v2040_v53  ;;  %v2519_v51 = vstv %s3038_s25  ;;  %s2703_s25 = sshll.u32 %s3973_s12, 4  ;;  %s4239_s25 = int_to_ptr.vmem [resolvable:$true] %s2703_s25 }
 0x898   : > { %p3544_p1 = scmp.lt.s32.totalorder %s4239_s25, %s3542_s23 }
 0x899   : > { %v2042_v55 = vmul.f32 1.442695, %v2041_v54 }
 0x89b   : > { %3514 = vpow2.f32 %v2042_v55 }
 0x8a5   : > { %v3515_v56 = vpop.eup %3514 }
 0x8a6   : > { %v2044_v57 = vsel %vm507_vm2, %v3515_v56, 0.0 }
 0x8a7   : > { %2045 = vadd.xlane.f32.xlu1 %v2044_v57  ;;  %v2532_v57 = vstv %s3039_s26 }
 0x934   : > { %v2046_v6 = vpop.xlane.xlu1 %2045 }
 0x935   : > { %3516 = vrcp.f32 %v2046_v6 }
 0x93f   : > { %v3517_v11 = vpop.eup %3516 }
 0x940   : > { %v2048_v13 = vmul.f32 %v3517_v11, %v3515_v56  ;;  %v2541_v56 = vstv %s3040_s11 }
 0x942   : > { %3007 = vst.msk [vmem:[%s3973_s12 + $0x10] sm:$0xff] %vm507_vm2, %v2048_v13  ;;  %3302 = vmatmul.mubr.msk.f32.vlgmr.msra.gmra.mrb[18].mxu0 %vm507_vm2, %v2048_v13 }
 0x943   : > { %3415 = vmatpush3.bf16.msra.mxu0 %v3414_v12  ;;  %3323 = vmatprep.mubr.msk.f32.mxu0 %vm3655_vm0, %v3656_v16 }
 0x944   : > { %3416 = vmatprep.subr.bf16.mxu0 %v3654_v8 }
 0x947   : > { %3418 = vmatpush3.bf16.msra.mxu0 %v3417_v20 }
 0x94a   : > { %3324 = vmatmul.mubr.msk.f32.vlgmr.msra.gmra.mrb[20].mxu0 %vm560_vm1, %v3845_v19 }
 0x94b   : > { %3339 = vmatprep.mubr.msk.f32.mxu0 %vm507_vm2, %v2218_v23 }
 0xa15   : > { %v4177_v28 = vpop.f32.mrb[18].mxu0 }
 0xa16   : > { %v3303_v29 = vpop.f32.mrb[19].mxu0 }
 0xa1d   : > { %v2293_v34 = vpop.f32.mrb[20].mxu0 }
 0xa1e   : > { %v2294_v37 = vadd.f32 %v3026_v31, %v2293_v34  ;;  %v3325_v38 = vpop.f32.mrb[21].mxu0 }
 0xa20   : > { %3337 = vmatprep.subr.msk.mxu0 %vm507_vm2, %v2294_v37 }
 0xa21   : > { %3338 = vmatpush3.xpose.msk.msra.mxu0 %vm507_vm2, %v2294_v37 }
 0xa24   : > { %3340 = vmatmul.mubr.msk.f32.vlgmr.msra.gmra.mrb[22].mxu0 %vm507_vm2, %v2379_v40 }
 0xa25   : > { %3342 = vmatprep.mubr.msk.f32.mxu0 %vm507_vm2, %v2384_v41 }
 0xa28   : > { %3343 = vmatmul.mubr.msk.f32.gmra.mrb[24].mxu0 %vm507_vm2, %v2389_v25 }
 0xa29   : > { %3345 = vmatprep.mubr.msk.f32.mxu0 %vm507_vm2, %v2394_v26 }
 0xa2c   : > { %3346 = vmatmul.mubr.msk.f32.gmra.mrb[26].mxu0 %vm507_vm2, %v2399_v46 }
 0xaf7   : > { %v3341_v52 = vpop.f32.mrb[22].mxu0 }
 0xaf8   : > { %v2520_v53 = vadd.f32 %v3341_v52, %v2519_v51  ;;  %v2487_v54 = vpop.f32.mrb[23].mxu0 }
 0xaf9   : > { %v2516_v8 = vadd.f32 %v3918_v1, %v2487_v54 }
 0xafa   : > { %v2522_v55 = vmul.f32 %v2520_v53, %v3920_v3 }
 0xafb   : > { %v3344_v58 = vpop.f32.mrb[24].mxu0 }
 0xafc   : > { %v2523_v19 = vadd.f32 %v2522_v55, %v2516_v8  ;;  %v2497_v59 = vpop.f32.mrb[25].mxu0  ;;  %v2542_v60 = vadd.f32 %v3344_v58, %v2541_v56 }
 0xafd   : > { %v2533_v16 = vadd.f32 %v2532_v57, %v2497_v59 }
 0xafe   : > { %v2544_v4 = vmul.f32 %v2542_v60, %v3926_v18 }
 0xaff   : > { %v2535_v63 = vmul.f32 %v2533_v16, %v3924_v14  ;;  %v3347_v0 = vpop.f32.mrb[26].mxu0 }
 0xb00   : > { %v2507_v2 = vpop.f32.mrb[27].mxu0  ;;  %v2560_v6 = vadd.f32 %v3347_v0, %v2559_v61 }
 0xb01   : > { %v2536_v5 = vadd.f32 %v2535_v63, %v2523_v19  ;;  %v2551_v1 = vadd.f32 %v2550_v62, %v2507_v2 }
 0xb02   : > { %v2562_v10 = vmul.f32 %v2560_v6, %v3932_v32  ;;  %v2369_v32 = vpop.f32.mrb[24].mxu1 }
 0xb03   : > { %v2553_v3 = vmul.f32 %v2551_v1, %v3929_v27  ;;  %v2545_v7 = vadd.f32 %v2544_v4, %v2536_v5  ;;  %v3336_v20 = vpop.f32.mrb[25].mxu1 }
 0xb05   : > { %v2554_v11 = vadd.f32 %v2553_v3, %v2545_v7 }
 0xb07   : > { %v2563_v12 = vadd.f32 %v2562_v10, %v2554_v11 }
 0xb09   : > { %v2564_v13 = vsel %vm507_vm2, %v2563_v12, -inf }
 0xb0a   : > { %2565 = vmax.xlane.f32.xlu0 %v2564_v13 }
 0xb20   : > { %2651 = vrot.lane.b32.xlu0 %v4082_v50, %s3657_s14  ;;  %v3028_v50 = vld [vmem:[%s4325_s2 + $0xb] ss:$0 sm:$0xff] }
 0xb21   : > { %v2370_v21 = vadd.f32 %v3028_v50, %v2369_v32 }
 0xb23   : > { %3349 = vmatpush3.msra.mxu1 %v2370_v21 }
 0xb97   : > { %v2566_v14 = vpop.xlane.xlu0 %2565 }
 0xb98   : > { %v2567_v15 = vsub.f32 %v2563_v12, %v2566_v14 }
 0xb9a   : > { %v2568_v18 = vmul.f32 1.442695, %v2567_v15 }
 0xb9c   : > { %3518 = vpow2.f32 %v2568_v18 }
 0xba6   : > { %v3519_v17 = vpop.eup %3518 }
 0xba7   : > { %v2570_v27 = vsel %vm507_vm2, %v3519_v17, 0.0 }
 0xba8   : > { %2571 = vadd.xlane.f32.xlu1 %v2570_v27 }
 0xbb9   : > { %2655 = vrot.lane.b32.xlu1 %v4177_v28, %s3658_s17  ;;  %s3537_s17 = scalar_lea.vmem %s4239_s25, 512 }
 0xbba   : > { %p3538_p11 = scmp.ne.s32.totalorder %s4239_s25, %s3537_s17 }
 0xbbc   : > { %p3539_p13 = pnand %p3538_p11, %p4338_p12 }
 0xbbe   : > { %p3540_p0 = pneg %p3539_p13 }
 0xc35   : > { %v2572_v22 = vpop.xlane.xlu1 %2571 }
 0xc36   : > { %3520 = vrcp.f32 %v2572_v22 }
 0xc40   : > { %v3521_v23 = vpop.eup %3520 }
 0xc41   : > { %v2574_v24 = vmul.f32 %v3521_v23, %v3519_v17 }
 0xc43   : > { %3043 = vst.msk [vmem:[%s3973_s12 + $0x18] sm:$0xff] %vm507_vm2, %v2574_v24  ;;  %3351 = vmatmul.mubr.msk.f32.vlgmr.msra.gmra.mrb[26].mxu1 %vm507_vm2, %v2574_v24  ;;  %s3543_s12 = scalar_lea.vmem %s3542_s23, 1024 }
 0xc44   : > { %p3545_p2 = scmp.lt.s32.totalorder %s3543_s12, %s3537_s17 }
 0xc46   : > { %p3546_p3 = por %p3545_p2, %p3544_p1 }
 0xc48   : > { %p3547_p6 = pnand %p3546_p3, %p3540_p0 }
 0xc4a   : > { %3550 = shalt.err (!%p3547_p6)
}
 0xc4b   : > { %s3551_s24 = scalar_lea.hbm %s4237_s21, 512  ;;  %s3555_s22 = scalar_lea.hbm %s4331_s8, 1024 }
 0xc4c   : > { %p3552_p7 = scmp.ne.s32.totalorder %s4237_s21, %s3551_s24  ;;  %p3556_p10 = scmp.lt.u32.totalorder %s4237_s21, %s4331_s8 }
 0xc4d   : > { %p3557_p4 = scmp.lt.u32.totalorder %s3555_s22, %s3551_s24  ;;  %p3559_p13 = scmp.lt.u32.totalorder %s3551_s24, %s4237_s21 }
 0xc4e   : > { %p3553_p8 = pnand %p3552_p7, %p4338_p12 }
 0xc4f   : > { %p3558_p11 = por %p3557_p4, %p3556_p10 }
 0xc50   : > { %p3554_p9 = pneg %p3553_p8 }
 0xc51   : > { %p3560_p0 = por %p3559_p13, %p3558_p11 }
 0xc53   : > { %p3561_p1 = pnand %p3560_p0, %p3554_p9 }
 0xc55   : > { %3564 = shalt.err (!%p3561_p1)
}
 0xc56   : > { %s3660_s17 = smov 128   ;;  %s4339_s12 = scalar_lea.sflag [#allocation9], %s3796_s15  ;;  %v2652_v30 = vpop.permute.xlu0 %2651  ;;  %v2656_v31 = vpop.permute.xlu1 %2655  ;;  %vm2663_vm3 = vcmask 130048   ;;  %vm2665_vm4 = vcmask 195584  }
 0xc57   : > { %3433 = dma.vmem_to_hbm [thread:$0]  (%p4338_p12), %s4239_s25, 512, %s4237_s21, %s4339_s12, %s3660_s17, %s3660_s17, %s3657_s14   ;;  %v2662_v33 = vsel %vm507_vm2, %v3987_v9, %v2652_v30 }
 0xc58   : > { %s3661_s20 = smov 24   ;;  %s2901_s24 = sshll.u32 %s3796_s15, 3  ;;  %v2664_v34 = vsel %vm2663_vm3, %v2662_v33, %v2656_v31 }
 0xc59   : > { %s3047_s11 = sshll.u32 %s3643_s30, 7  ;;  %s466_s26 = scalar_lea.vmem [#allocation7], %s2901_s24 }
 0xc5a   : > { %s2688_s22 = sshll.u32 %s466_s26, 4  ;;  %s4273_s21 = scalar_lea.hbm %s4330_s7, %s3047_s11  ;;  %s4275_s22 = int_to_ptr.vmem [resolvable:$true] %s2688_s22 }
 0xc5b   : > { %s2669_s30 = scalar_lea.sflag [#allocation5], %s3796_s15  ;;  %s3565_s23 = scalar_lea.vmem %s4275_s22, 128 }
 0xc5c   : > { %p3566_p2 = scmp.ne.s32.totalorder %s4275_s22, %s3565_s23  ;;  %s3662_s17 = smov [#allocation7]  }
 0xc5d   : > { %s3569_s12 = sshll.u32 %s3662_s17, 4  ;;  %s3570_s12 = int_to_ptr.vmem [resolvable:$false] %s3569_s12 }
 0xc5e   : > { %p3567_p3 = pnand %p3566_p2, %p4338_p12  ;;  %p3572_p7 = scmp.lt.s32.totalorder %s4275_s22, %s3570_s12 }
 0xc60   : > { %p3568_p6 = pneg %p3567_p3 }
 0xd16   : > { %v2646_v28 = vpop.f32.mrb[26].mxu1 }
 0xd17   : > { %2659 = vrot.lane.b32.xlu1 %v2646_v28, %s3661_s20  ;;  %v3352_v29 = vpop.f32.mrb[27].mxu1  ;;  %s3571_s20 = scalar_lea.vmem %s3570_s12, 256 }
 0xd18   : > { %p3573_p8 = scmp.lt.s32.totalorder %s3571_s20, %s3565_s23 }
 0xd1a   : > { %p3574_p9 = por %p3573_p8, %p3572_p7 }
 0xd1c   : > { %p3575_p10 = pnand %p3574_p9, %p3568_p6 }
 0xd89   : > { %v2660_v35 = vpop.permute.xlu1 %2659 }
 0xd8a   : > { %v2666_v37 = vsel %vm2665_vm4, %v2664_v34, %v2660_v35 }
 0xd8b   : > { %2667 = vst.msk [vmem:[%s466_s26] sm:$0xff] %vm560_vm1, %v2666_v37 }
 0xd8c   : > { %3578 = shalt.err (!%p3575_p10)
}
 0xd8d   : > { %s3579_s15 = scalar_lea.hbm %s4273_s21, 128  ;;  %s3583_s26 = scalar_lea.hbm %s4330_s7, 256 }
 0xd8e   : > { %p3580_p4 = scmp.ne.s32.totalorder %s4273_s21, %s3579_s15  ;;  %p3584_p0 = scmp.lt.u32.totalorder %s4273_s21, %s4330_s7 }
 0xd8f   : > { %p3585_p1 = scmp.lt.u32.totalorder %s3583_s26, %s3579_s15  ;;  %p3587_p3 = scmp.lt.u32.totalorder %s3579_s15, %s4273_s21 }
 0xd90   : > { %p3581_p11 = pnand %p3580_p4, %p4338_p12 }
 0xd91   : > { %p3586_p2 = por %p3585_p1, %p3584_p0 }
 0xd92   : > { %p3582_p13 = pneg %p3581_p11 }
 0xd93   : > { %p3588_p6 = por %p3587_p3, %p3586_p2 }
 0xd95   : > { %p3589_p7 = pnand %p3588_p6, %p3582_p13 }
 0xd97   : > { %3592 = shalt.err (!%p3589_p7)
}
 0xd98   : > { %3432 = dma.vmem_to_hbm [thread:$0]  (%p4338_p12), %s4275_s22, 128, %s4273_s21, %s2669_s30  }
 0xd99 PF: > { %s2718_s23 = sand.u32 1, %s3631_s27   ;;  %p4340_p8 = scmp.ne.s32.totalorder %s4335_s19, 0 }
 0xd9a   : > { %s2719_s17 = scalar_lea.sflag [#allocation5], %s2718_s23 }
 0xd9b   : > { %p3441_p9 = pnand %p2897_p5, %p4340_p8 }
 0xd9d   : > { %3622 = dma.done.wait (!%p3441_p9), %s2719_s17, 128  }
 0xd9e   : > { %3624 = vsyncadd (!%p3441_p9), %s2719_s17, 4294967168  ;;  %s2728_s12 = scalar_lea.sflag [#allocation9], %s2718_s23 }
 0xd9f   : > { %3626 = dma.done.wait (!%p3441_p9), %s2728_s12, 512  }
 0xda0   : > { %3628 = vsyncadd (!%p3441_p9), %s2728_s12, 4294966784  ;;  %s26_s10 = sadd.s32 1, %s3651_s10   ;;  %s4341_s27 = smov %s3635_s28 }
 0xda1   : > { %p23_p10 = scmp.ge.s32.totalorder %s26_s10, 4   ;;  %s4342_s28 = smov %s3639_s29 }
 0xda2   : > { %s4343_s29 = smov %s3762_s18  ;;  %s4344_s30 = smov %s3647_s9 }
 0xda3   : > { %s4345_s9 = smov %s4347_s13  ;;  %25 = sbr.rel (!%p23_p10) target bundleno = 7 (0x7), region = 210 }
 0xdaa   :  { %2733 = vsyncpa [#allocation5], 1 }
 0xdab   :  { %2735 = vsyncpa [#allocation5 + $0x1], 1 }
 0xdac   :  { %2736 = vsyncpa [#allocation9], 1 }
 0xdad   :  { %2738 = vsyncpa [#allocation9 + $0x1], 1 }
 0xdae   :  { %2739 = vsyncpa [#allocation6], 1 }
 0xdaf   :  { %2741 = vsyncpa [#allocation6 + $0x1], 1 }

</bundles_post_ra>
